<compile_context>
chip_gen: v5e
topology: v5e:2x2
jax: 0.10.0
libtpu: 0.0.40
codegen_flags: <defaults>
</compile_context>

<pallas_src>
import functools

import jax
import jax.numpy as jnp
import numpy as np
from jax import lax
from jax.experimental import pallas as pl
from jax.experimental.pallas import tpu as pltpu  # noqa: F401  (TPU backend)


# ----------------------------- fused Pallas kernel ---------------------------

def _fused_forward_kernel(
        xs_ref, xo_ref, act_ref,
        cswb_ref, csbb_ref, lswbs_ref, lsbs_ref,
        cowb_ref, cobb_ref, lswbo_ref, lsbo_ref,
        w1s_ref, w1o_ref, w1a_ref, b1_ref,
        w2_ref, b2_ref, w3_ref, b3_ref,
        o_ref,
        *, bs, n_agents, s_width, o_width, bpad):
    """Whole SSD_MADDPGCritic forward; everything lives in VMEM."""
    f32 = jnp.float32

    def conv_branch(x_ref, tapw_ref, cbias_ref, linw_ref, lbias_ref, width):
        # x_ref    : (n_samples*C, H*W)  raw pixels in [0, 255]
        # tapw_ref : (9, OC*rows_blk, n_samples*C) block-diag per-tap conv wts
        # cbias_ref: (OC*rows_blk, 1)
        # linw_ref : (OC, P, RH)  Flatten->Linear wts, zero at invalid columns
        # lbias_ref: (1, RH)
        x = x_ref[...].astype(f32) * (1.0 / 255.0)
        oc_n, p_len, rh = linw_ref.shape
        rows = tapw_ref.shape[1]
        rows_blk = rows // oc_n
        # 3x3 valid conv == 9 lane-shifted matmuls; every valid output
        # position (i, j) maps to lane i*width + j < p_len.
        acc = jnp.zeros((rows, p_len), f32)
        for t in range(9):
            shift = (t // 3) * width + (t % 3)
            acc = acc + jnp.dot(tapw_ref[t], x[:, shift:shift + p_len],
                                preferred_element_type=f32)
        y = jnp.maximum(acc + cbias_ref[...], 0.0)        # conv + bias + ReLU
        # Flatten + Linear, contracted per output-channel block (8-aligned rows)
        z = jnp.zeros((rows_blk, rh), f32)
        for oc in range(oc_n):
            z = z + jnp.dot(y[oc * rows_blk:(oc + 1) * rows_blk, :],
                            linw_ref[oc], preferred_element_type=f32)
        return jnp.maximum(z + lbias_ref[...], 0.0)       # (rows_blk, RH)

    zs = conv_branch(xs_ref, cswb_ref, csbb_ref, lswbs_ref, lsbs_ref, s_width)
    zo = conv_branch(xo_ref, cowb_ref, cobb_ref, lswbo_ref, lsbo_ref, o_width)

    # fc1 over the (never materialized) concat [state | obs per agent | actions]
    h = jnp.dot(zs[0:bs, :], w1s_ref[...], preferred_element_type=f32)
    for a in range(n_agents):
        h = h + jnp.dot(zo[a * bpad:a * bpad + bs, :], w1o_ref[a],
                        preferred_element_type=f32)
    h = h + jnp.dot(act_ref[...], w1a_ref[...], preferred_element_type=f32)
    h = jnp.maximum(h + b1_ref[...], 0.0)
    h = jnp.maximum(jnp.dot(h, w2_ref[...], preferred_element_type=f32)
                    + b2_ref[...], 0.0)
    q = jnp.dot(h, w3_ref[...], preferred_element_type=f32) + b3_ref[...]
    o_ref[...] = q.astype(o_ref.dtype)


# ----------------------------- one-time weight repack ------------------------

def prepare_params(params, cfg, bs):
    """Repack PyTorch-layout params into the fused-kernel layout (run once)."""
    n_agents, n_actions = cfg["n_agents"], cfg["n_actions"]
    C, OC, RH = cfg["C"], cfg["out_channels"], cfg["rnn_hidden_dim"]
    sH, sW = cfg["state_H"], cfg["state_W"]
    oH, oW = cfg["obs_H"], cfg["obs_W"]
    bpad = ((bs + 7) // 8) * 8          # pad batch rows to a sublane multiple
    sHs, sWs = sH - 2, sW - 2
    oHs, oWs = oH - 2, oW - 2
    sP = sHs * sW - 2                   # valid shifted-conv output length
    oP = oHs * oW - 2

    def conv_tap_weights(cw, n_in, rows_per_oc, out_row):
        cw = np.asarray(cw, np.float32)                  # (OC, C, 3, 3)
        w = np.zeros((9, OC * rows_per_oc, n_in * C), np.float32)
        for t in range(9):
            kh, kw = divmod(t, 3)
            for oc in range(OC):
                for s_in in range(n_in):
                    r = out_row(s_in)
                    w[t, oc * rows_per_oc + r,
                      s_in * C:(s_in + 1) * C] = cw[oc, :, kh, kw]
        return w

    def post_conv_linear(lw, Hs, Ws, w_in, p_len):
        lw = np.asarray(lw, np.float32).reshape(RH, OC, Hs, Ws)
        out = np.zeros((OC, p_len, RH), np.float32)
        for i in range(Hs):
            out[:, i * w_in:i * w_in + Ws, :] = np.transpose(
                lw[:, :, i, :], (1, 2, 0))
        return out

    # state branch: input sample b -> output row b (within each oc block)
    cswb = conv_tap_weights(params["cs_w"], bs, bpad, lambda b: b)
    csbb = np.repeat(np.asarray(params["cs_b"], np.float32), bpad)[:, None]
    lswbs = post_conv_linear(params["ls_w"], sHs, sWs, sW, sP)
    lsbs = np.asarray(params["ls_b"], np.float32)[None, :]

    # obs branch: PyTorch row order is b*n_agents + a; we emit rows a*bpad + b
    # so the per-agent feature blocks used by fc1 are 8-aligned.
    def obs_row(s_in):
        b, a = divmod(s_in, n_agents)
        return a * bpad + b

    cowb = conv_tap_weights(params["co_w"], bs * n_agents, n_agents * bpad,
                            obs_row)
    cobb = np.repeat(np.asarray(params["co_b"], np.float32),
                     n_agents * bpad)[:, None]
    lswbo = post_conv_linear(params["lo_w"], oHs, oWs, oW, oP)
    lsbo = np.asarray(params["lo_b"], np.float32)[None, :]

    w1 = np.asarray(params["w1"], np.float32)            # (128, in_dim)
    w1s = np.ascontiguousarray(w1[:, :RH].T)
    w1o = np.stack(
        [np.ascontiguousarray(w1[:, RH + a * RH: RH + (a + 1) * RH].T)
         for a in range(n_agents)], axis=0)
    w1a = np.ascontiguousarray(w1[:, RH * (1 + n_agents):].T)
    b1 = np.asarray(params["b1"], np.float32)[None, :]
    w2 = np.ascontiguousarray(np.asarray(params["w2"], np.float32).T)
    b2 = np.asarray(params["b2"], np.float32)[None, :]
    w3 = np.ascontiguousarray(np.asarray(params["w3"], np.float32).T)
    b3 = np.asarray(params["b3"], np.float32)[None, :]

    prep = dict(cswb=cswb, csbb=csbb, lswbs=lswbs, lsbs=lsbs,
                cowb=cowb, cobb=cobb, lswbo=lswbo, lsbo=lsbo,
                w1s=w1s, w1o=w1o, w1a=w1a, b1=b1, w2=w2, b2=b2, w3=w3, b3=b3)
    prep = {k: jnp.asarray(v, jnp.float32) for k, v in prep.items()}
    prep["meta"] = dict(bs=bs, bpad=bpad, n_agents=n_agents,
                        n_actions=n_actions, C=C, OC=OC, RH=RH,
                        sH=sH, sW=sW, oH=oH, oW=oW, sP=sP, oP=oP)
    return prep


# ----------------------------- forward wrapper --------------------------------

def maddpg_critic_forward(prep, obs, state, actions):
    m = prep["meta"]
    bs, na, C = m["bs"], m["n_agents"], m["C"]

    # Only contiguity-preserving (free) reshapes outside the kernel.
    xs = state.reshape(bs * C, m["sH"] * m["sW"]).astype(jnp.float32)
    xo = obs.reshape(bs * na * C, m["oH"] * m["oW"]).astype(jnp.float32)
    acts = actions.reshape(bs, na * m["n_actions"]).astype(jnp.float32)

    kernel = functools.partial(_fused_forward_kernel, bs=bs, n_agents=na,
                               s_width=m["sW"], o_width=m["oW"],
                               bpad=m["bpad"])

    args = (xs, xo, acts,
            prep["cswb"], prep["csbb"], prep["lswbs"], prep["lsbs"],
            prep["cowb"], prep["cobb"], prep["lswbo"], prep["lsbo"],
            prep["w1s"], prep["w1o"], prep["w1a"], prep["b1"],
            prep["w2"], prep["b2"], prep["w3"], prep["b3"])

    OC, RH, bpad, sP, oP = m["OC"], m["RH"], m["bpad"], m["sP"], m["oP"]
    nact = m["n_actions"]
    flops = (9 * 2 * (OC * bpad) * (bs * C) * sP
             + OC * 2 * bpad * sP * RH
             + 9 * 2 * (OC * na * bpad) * (bs * na * C) * oP
             + OC * 2 * (na * bpad) * oP * RH
             + 2 * bs * RH * 128 * (1 + na)
             + 2 * bs * (nact * na) * 128
             + 2 * bs * 128 * 128 + 2 * bs * 128)
    bytes_accessed = sum(int(a.size) * 4 for a in args) + bs * 4

    return pl.pallas_call(
        kernel,
        out_shape=jax.ShapeDtypeStruct((bs, 1), jnp.float32),
        cost_estimate=pl.CostEstimate(flops=int(flops), transcendentals=0,
                                      bytes_accessed=int(bytes_accessed)),
    )(*args)


# ----------------------------- pure-JAX reference ----------------------------

def reference_forward(params, obs, state, actions, cfg):
    n_agents, n_actions = cfg["n_agents"], cfg["n_actions"]
    C, RH = cfg["C"], cfg["rnn_hidden_dim"]

    def conv_seq(x, cw, cb, lw, lb):
        y = lax.conv_general_dilated(x, cw, (1, 1), "VALID",
                                     dimension_numbers=("NCHW", "OIHW", "NCHW"))
        y = jax.nn.relu(y + cb.reshape(1, -1, 1, 1))
        y = y.reshape(y.shape[0], -1)
        return jax.nn.relu(y @ lw.T + lb)

    s = (state / 255.0).reshape(-1, C, cfg["state_H"], cfg["state_W"])
    s = conv_seq(s, params["cs_w"], params["cs_b"],
                 params["ls_w"], params["ls_b"]).reshape(-1, RH)
    o = (obs / 255.0).reshape(-1, C, cfg["obs_H"], cfg["obs_W"])
    o = conv_seq(o, params["co_w"], params["co_b"],
                 params["lo_w"], params["lo_b"]).reshape(-1, RH * n_agents)
    a = actions.reshape(-1, n_actions * n_agents)
    x = jnp.concatenate([s, o, a], axis=-1)
    x = jax.nn.relu(x @ params["w1"].T + params["b1"])
    x = jax.nn.relu(x @ params["w2"].T + params["b2"])
    return x @ params["w3"].T + params["b3"]


# ----------------------------- main -------------------------------------------

if __name__ == "__main__":
    cfg = dict(n_agents=3, n_actions=5, C=3, state_H=16, state_W=16,
               obs_H=8, obs_W=8, out_channels=4, rnn_hidden_dim=32,
               kernel_size=3)
    bs = 2
    OC, RH, C = cfg["out_channels"], cfg["rnn_hidden_dim"], cfg["C"]
    sH, sW, oH, oW = cfg["state_H"], cfg["state_W"], cfg["obs_H"], cfg["obs_W"]
    in_dim = RH + RH * cfg["n_agents"] + cfg["n_actions"] * cfg["n_agents"]

    key = jax.random.PRNGKey(0)
    ks = jax.random.split(key, 16)
    p = lambda k, shape, s=0.05: (jax.random.normal(k, shape, jnp.float32) * s)

    params = {
        "cs_w": p(ks[0], (OC, C, 3, 3)), "cs_b": p(ks[1], (OC,)),
        "ls_w": p(ks[2], (RH, OC * (sH - 2) * (sW - 2))), "ls_b": p(ks[3], (RH,)),
        "co_w": p(ks[4], (OC, C, 3, 3)), "co_b": p(ks[5], (OC,)),
        "lo_w": p(ks[6], (RH, OC * (oH - 2) * (oW - 2))), "lo_b": p(ks[7], (RH,)),
        "w1": p(ks[8], (128, in_dim)), "b1": p(ks[9], (128,)),
        "w2": p(ks[10], (128, 128)), "b2": p(ks[11], (128,)),
        "w3": p(ks[12], (1, 128)), "b3": p(ks[13], (1,)),
    }

    dkey = jax.random.split(ks[14], 3)
    state = jax.random.uniform(dkey[0], (bs, C, sH, sW), jnp.float32, 0.0, 255.0)
    obs = jax.random.uniform(dkey[1], (bs, cfg["n_agents"], C, oH, oW),
                             jnp.float32, 0.0, 255.0)
    actions = jax.random.uniform(dkey[2], (bs, cfg["n_agents"], cfg["n_actions"]),
                                 jnp.float32)

    prep = prepare_params(params, cfg, bs)          # one-time weight repack
    q = maddpg_critic_forward(prep, obs, state, actions)
    q = jax.block_until_ready(q)

    q_ref = reference_forward(params, obs, state, actions, cfg)
    assert q.shape == (bs, 1), q.shape
    assert jnp.allclose(q, q_ref, rtol=5e-3, atol=5e-3), (q, q_ref)

    print("KERNEL_OK")
</pallas_src>

<mosaic_0001>
module attributes {stable_mosaic.version = 11 : i64} {
  func.func @_fused_forward_kernel(%arg0: memref<6x256xf32, #tpu.memory_space<vmem>>, %arg1: memref<18x64xf32, #tpu.memory_space<vmem>>, %arg2: memref<2x15xf32, #tpu.memory_space<vmem>>, %arg3: memref<9x32x6xf32, #tpu.memory_space<vmem>>, %arg4: memref<32x1xf32, #tpu.memory_space<vmem>>, %arg5: memref<4x222x32xf32, #tpu.memory_space<vmem>>, %arg6: memref<1x32xf32, #tpu.memory_space<vmem>>, %arg7: memref<9x96x18xf32, #tpu.memory_space<vmem>>, %arg8: memref<96x1xf32, #tpu.memory_space<vmem>>, %arg9: memref<4x46x32xf32, #tpu.memory_space<vmem>>, %arg10: memref<1x32xf32, #tpu.memory_space<vmem>>, %arg11: memref<32x128xf32, #tpu.memory_space<vmem>>, %arg12: memref<3x32x128xf32, #tpu.memory_space<vmem>>, %arg13: memref<15x128xf32, #tpu.memory_space<vmem>>, %arg14: memref<1x128xf32, #tpu.memory_space<vmem>>, %arg15: memref<128x128xf32, #tpu.memory_space<vmem>>, %arg16: memref<1x128xf32, #tpu.memory_space<vmem>>, %arg17: memref<128x1xf32, #tpu.memory_space<vmem>>, %arg18: memref<1x1xf32, #tpu.memory_space<vmem>>, %arg19: memref<2x1xf32, #tpu.memory_space<vmem>>) attributes {dimension_semantics = [], scalar_prefetch = 0 : i64, scratch_operands = 0 : i64, tpu.core_type = #tpu.core_type<tc>} {
    %c0 = arith.constant 0 : index
    %c0_0 = arith.constant 0 : index
    %0 = vector.load %arg0[%c0, %c0_0] : memref<6x256xf32, #tpu.memory_space<vmem>>, vector<6x256xf32>
    %cst = arith.constant 0.00392156886 : f32
    %1 = vector.broadcast %cst : f32 to vector<6x256xf32>
    %2 = arith.mulf %0, %1 : vector<6x256xf32>
    %cst_1 = arith.constant 0.000000e+00 : f32
    %3 = vector.broadcast %cst_1 : f32 to vector<32x222xf32>
    %c0_2 = arith.constant 0 : index
    %c0_3 = arith.constant 0 : index
    %c0_4 = arith.constant 0 : index
    %4 = vector.load %arg3[%c0_2, %c0_3, %c0_4] : memref<9x32x6xf32, #tpu.memory_space<vmem>>, vector<1x32x6xf32>
    %5 = vector.shape_cast %4 : vector<1x32x6xf32> to vector<32x6xf32>
    %6 = vector.extract_strided_slice %2 {offsets = [0, 0], sizes = [6, 222], strides = [1, 1]} : vector<6x256xf32> to vector<6x222xf32>
    %cst_5 = arith.constant dense<0.000000e+00> : vector<32x222xf32>
    %7 = tpu.matmul %5, %6, %cst_5 {dimension_numbers = #tpu.dot_dimension_numbers<[1], [0], [0], [1], [0, 0, 1, 1], [], []>} : vector<32x6xf32>, vector<6x222xf32>, vector<32x222xf32> -> vector<32x222xf32>
    %8 = arith.addf %3, %7 : vector<32x222xf32>
    %c1 = arith.constant 1 : index
    %c0_6 = arith.constant 0 : index
    %c0_7 = arith.constant 0 : index
    %9 = vector.load %arg3[%c1, %c0_6, %c0_7] : memref<9x32x6xf32, #tpu.memory_space<vmem>>, vector<1x32x6xf32>
    %10 = vector.shape_cast %9 : vector<1x32x6xf32> to vector<32x6xf32>
    %11 = vector.extract_strided_slice %2 {offsets = [0, 1], sizes = [6, 222], strides = [1, 1]} : vector<6x256xf32> to vector<6x222xf32>
    %cst_8 = arith.constant dense<0.000000e+00> : vector<32x222xf32>
    %12 = tpu.matmul %10, %11, %cst_8 {dimension_numbers = #tpu.dot_dimension_numbers<[1], [0], [0], [1], [0, 0, 1, 1], [], []>} : vector<32x6xf32>, vector<6x222xf32>, vector<32x222xf32> -> vector<32x222xf32>
    %13 = arith.addf %8, %12 : vector<32x222xf32>
    %c2 = arith.constant 2 : index
    %c0_9 = arith.constant 0 : index
    %c0_10 = arith.constant 0 : index
    %14 = vector.load %arg3[%c2, %c0_9, %c0_10] : memref<9x32x6xf32, #tpu.memory_space<vmem>>, vector<1x32x6xf32>
    %15 = vector.shape_cast %14 : vector<1x32x6xf32> to vector<32x6xf32>
    %16 = vector.extract_strided_slice %2 {offsets = [0, 2], sizes = [6, 222], strides = [1, 1]} : vector<6x256xf32> to vector<6x222xf32>
    %cst_11 = arith.constant dense<0.000000e+00> : vector<32x222xf32>
    %17 = tpu.matmul %15, %16, %cst_11 {dimension_numbers = #tpu.dot_dimension_numbers<[1], [0], [0], [1], [0, 0, 1, 1], [], []>} : vector<32x6xf32>, vector<6x222xf32>, vector<32x222xf32> -> vector<32x222xf32>
    %18 = arith.addf %13, %17 : vector<32x222xf32>
    %c3 = arith.constant 3 : index
    %c0_12 = arith.constant 0 : index
    %c0_13 = arith.constant 0 : index
    %19 = vector.load %arg3[%c3, %c0_12, %c0_13] : memref<9x32x6xf32, #tpu.memory_space<vmem>>, vector<1x32x6xf32>
    %20 = vector.shape_cast %19 : vector<1x32x6xf32> to vector<32x6xf32>
    %21 = vector.extract_strided_slice %2 {offsets = [0, 16], sizes = [6, 222], strides = [1, 1]} : vector<6x256xf32> to vector<6x222xf32>
    %cst_14 = arith.constant dense<0.000000e+00> : vector<32x222xf32>
    %22 = tpu.matmul %20, %21, %cst_14 {dimension_numbers = #tpu.dot_dimension_numbers<[1], [0], [0], [1], [0, 0, 1, 1], [], []>} : vector<32x6xf32>, vector<6x222xf32>, vector<32x222xf32> -> vector<32x222xf32>
    %23 = arith.addf %18, %22 : vector<32x222xf32>
    %c4 = arith.constant 4 : index
    %c0_15 = arith.constant 0 : index
    %c0_16 = arith.constant 0 : index
    %24 = vector.load %arg3[%c4, %c0_15, %c0_16] : memref<9x32x6xf32, #tpu.memory_space<vmem>>, vector<1x32x6xf32>
    %25 = vector.shape_cast %24 : vector<1x32x6xf32> to vector<32x6xf32>
    %26 = vector.extract_strided_slice %2 {offsets = [0, 17], sizes = [6, 222], strides = [1, 1]} : vector<6x256xf32> to vector<6x222xf32>
    %cst_17 = arith.constant dense<0.000000e+00> : vector<32x222xf32>
    %27 = tpu.matmul %25, %26, %cst_17 {dimension_numbers = #tpu.dot_dimension_numbers<[1], [0], [0], [1], [0, 0, 1, 1], [], []>} : vector<32x6xf32>, vector<6x222xf32>, vector<32x222xf32> -> vector<32x222xf32>
    %28 = arith.addf %23, %27 : vector<32x222xf32>
    %c5 = arith.constant 5 : index
    %c0_18 = arith.constant 0 : index
    %c0_19 = arith.constant 0 : index
    %29 = vector.load %arg3[%c5, %c0_18, %c0_19] : memref<9x32x6xf32, #tpu.memory_space<vmem>>, vector<1x32x6xf32>
    %30 = vector.shape_cast %29 : vector<1x32x6xf32> to vector<32x6xf32>
    %31 = vector.extract_strided_slice %2 {offsets = [0, 18], sizes = [6, 222], strides = [1, 1]} : vector<6x256xf32> to vector<6x222xf32>
    %cst_20 = arith.constant dense<0.000000e+00> : vector<32x222xf32>
    %32 = tpu.matmul %30, %31, %cst_20 {dimension_numbers = #tpu.dot_dimension_numbers<[1], [0], [0], [1], [0, 0, 1, 1], [], []>} : vector<32x6xf32>, vector<6x222xf32>, vector<32x222xf32> -> vector<32x222xf32>
    %33 = arith.addf %28, %32 : vector<32x222xf32>
    %c6 = arith.constant 6 : index
    %c0_21 = arith.constant 0 : index
    %c0_22 = arith.constant 0 : index
    %34 = vector.load %arg3[%c6, %c0_21, %c0_22] : memref<9x32x6xf32, #tpu.memory_space<vmem>>, vector<1x32x6xf32>
    %35 = vector.shape_cast %34 : vector<1x32x6xf32> to vector<32x6xf32>
    %36 = vector.extract_strided_slice %2 {offsets = [0, 32], sizes = [6, 222], strides = [1, 1]} : vector<6x256xf32> to vector<6x222xf32>
    %cst_23 = arith.constant dense<0.000000e+00> : vector<32x222xf32>
    %37 = tpu.matmul %35, %36, %cst_23 {dimension_numbers = #tpu.dot_dimension_numbers<[1], [0], [0], [1], [0, 0, 1, 1], [], []>} : vector<32x6xf32>, vector<6x222xf32>, vector<32x222xf32> -> vector<32x222xf32>
    %38 = arith.addf %33, %37 : vector<32x222xf32>
    %c7 = arith.constant 7 : index
    %c0_24 = arith.constant 0 : index
    %c0_25 = arith.constant 0 : index
    %39 = vector.load %arg3[%c7, %c0_24, %c0_25] : memref<9x32x6xf32, #tpu.memory_space<vmem>>, vector<1x32x6xf32>
    %40 = vector.shape_cast %39 : vector<1x32x6xf32> to vector<32x6xf32>
    %41 = vector.extract_strided_slice %2 {offsets = [0, 33], sizes = [6, 222], strides = [1, 1]} : vector<6x256xf32> to vector<6x222xf32>
    %cst_26 = arith.constant dense<0.000000e+00> : vector<32x222xf32>
    %42 = tpu.matmul %40, %41, %cst_26 {dimension_numbers = #tpu.dot_dimension_numbers<[1], [0], [0], [1], [0, 0, 1, 1], [], []>} : vector<32x6xf32>, vector<6x222xf32>, vector<32x222xf32> -> vector<32x222xf32>
    %43 = arith.addf %38, %42 : vector<32x222xf32>
    %c8 = arith.constant 8 : index
    %c0_27 = arith.constant 0 : index
    %c0_28 = arith.constant 0 : index
    %44 = vector.load %arg3[%c8, %c0_27, %c0_28] : memref<9x32x6xf32, #tpu.memory_space<vmem>>, vector<1x32x6xf32>
    %45 = vector.shape_cast %44 : vector<1x32x6xf32> to vector<32x6xf32>
    %46 = vector.extract_strided_slice %2 {offsets = [0, 34], sizes = [6, 222], strides = [1, 1]} : vector<6x256xf32> to vector<6x222xf32>
    %cst_29 = arith.constant dense<0.000000e+00> : vector<32x222xf32>
    %47 = tpu.matmul %45, %46, %cst_29 {dimension_numbers = #tpu.dot_dimension_numbers<[1], [0], [0], [1], [0, 0, 1, 1], [], []>} : vector<32x6xf32>, vector<6x222xf32>, vector<32x222xf32> -> vector<32x222xf32>
    %48 = arith.addf %43, %47 : vector<32x222xf32>
    %c0_30 = arith.constant 0 : index
    %c0_31 = arith.constant 0 : index
    %49 = vector.load %arg4[%c0_30, %c0_31] : memref<32x1xf32, #tpu.memory_space<vmem>>, vector<32x1xf32>
    %50 = vector.broadcast %49 : vector<32x1xf32> to vector<32x222xf32>
    %51 = arith.addf %48, %50 : vector<32x222xf32>
    %cst_32 = arith.constant 0.000000e+00 : f32
    %52 = vector.broadcast %cst_32 : f32 to vector<32x222xf32>
    %53 = arith.maximumf %51, %52 : vector<32x222xf32>
    %cst_33 = arith.constant 0.000000e+00 : f32
    %54 = vector.broadcast %cst_33 : f32 to vector<8x32xf32>
    %55 = vector.extract_strided_slice %53 {offsets = [0, 0], sizes = [8, 222], strides = [1, 1]} : vector<32x222xf32> to vector<8x222xf32>
    %c0_34 = arith.constant 0 : index
    %c0_35 = arith.constant 0 : index
    %c0_36 = arith.constant 0 : index
    %56 = vector.load %arg5[%c0_34, %c0_35, %c0_36] : memref<4x222x32xf32, #tpu.memory_space<vmem>>, vector<1x222x32xf32>
    %57 = vector.shape_cast %56 : vector<1x222x32xf32> to vector<222x32xf32>
    %cst_37 = arith.constant dense<0.000000e+00> : vector<8x32xf32>
    %58 = tpu.matmul %55, %57, %cst_37 {dimension_numbers = #tpu.dot_dimension_numbers<[1], [0], [0], [1], [0, 0, 1, 1], [], []>} : vector<8x222xf32>, vector<222x32xf32>, vector<8x32xf32> -> vector<8x32xf32>
    %59 = arith.addf %54, %58 : vector<8x32xf32>
    %60 = vector.extract_strided_slice %53 {offsets = [8, 0], sizes = [8, 222], strides = [1, 1]} : vector<32x222xf32> to vector<8x222xf32>
    %c1_38 = arith.constant 1 : index
    %c0_39 = arith.constant 0 : index
    %c0_40 = arith.constant 0 : index
    %61 = vector.load %arg5[%c1_38, %c0_39, %c0_40] : memref<4x222x32xf32, #tpu.memory_space<vmem>>, vector<1x222x32xf32>
    %62 = vector.shape_cast %61 : vector<1x222x32xf32> to vector<222x32xf32>
    %cst_41 = arith.constant dense<0.000000e+00> : vector<8x32xf32>
    %63 = tpu.matmul %60, %62, %cst_41 {dimension_numbers = #tpu.dot_dimension_numbers<[1], [0], [0], [1], [0, 0, 1, 1], [], []>} : vector<8x222xf32>, vector<222x32xf32>, vector<8x32xf32> -> vector<8x32xf32>
    %64 = arith.addf %59, %63 : vector<8x32xf32>
    %65 = vector.extract_strided_slice %53 {offsets = [16, 0], sizes = [8, 222], strides = [1, 1]} : vector<32x222xf32> to vector<8x222xf32>
    %c2_42 = arith.constant 2 : index
    %c0_43 = arith.constant 0 : index
    %c0_44 = arith.constant 0 : index
    %66 = vector.load %arg5[%c2_42, %c0_43, %c0_44] : memref<4x222x32xf32, #tpu.memory_space<vmem>>, vector<1x222x32xf32>
    %67 = vector.shape_cast %66 : vector<1x222x32xf32> to vector<222x32xf32>
    %cst_45 = arith.constant dense<0.000000e+00> : vector<8x32xf32>
    %68 = tpu.matmul %65, %67, %cst_45 {dimension_numbers = #tpu.dot_dimension_numbers<[1], [0], [0], [1], [0, 0, 1, 1], [], []>} : vector<8x222xf32>, vector<222x32xf32>, vector<8x32xf32> -> vector<8x32xf32>
    %69 = arith.addf %64, %68 : vector<8x32xf32>
    %70 = vector.extract_strided_slice %53 {offsets = [24, 0], sizes = [8, 222], strides = [1, 1]} : vector<32x222xf32> to vector<8x222xf32>
    %c3_46 = arith.constant 3 : index
    %c0_47 = arith.constant 0 : index
    %c0_48 = arith.constant 0 : index
    %71 = vector.load %arg5[%c3_46, %c0_47, %c0_48] : memref<4x222x32xf32, #tpu.memory_space<vmem>>, vector<1x222x32xf32>
    %72 = vector.shape_cast %71 : vector<1x222x32xf32> to vector<222x32xf32>
    %cst_49 = arith.constant dense<0.000000e+00> : vector<8x32xf32>
    %73 = tpu.matmul %70, %72, %cst_49 {dimension_numbers = #tpu.dot_dimension_numbers<[1], [0], [0], [1], [0, 0, 1, 1], [], []>} : vector<8x222xf32>, vector<222x32xf32>, vector<8x32xf32> -> vector<8x32xf32>
    %74 = arith.addf %69, %73 : vector<8x32xf32>
    %c0_50 = arith.constant 0 : index
    %c0_51 = arith.constant 0 : index
    %75 = vector.load %arg6[%c0_50, %c0_51] : memref<1x32xf32, #tpu.memory_space<vmem>>, vector<1x32xf32>
    %76 = vector.broadcast %75 : vector<1x32xf32> to vector<8x32xf32>
    %77 = arith.addf %74, %76 : vector<8x32xf32>
    %cst_52 = arith.constant 0.000000e+00 : f32
    %78 = vector.broadcast %cst_52 : f32 to vector<8x32xf32>
    %79 = arith.maximumf %77, %78 : vector<8x32xf32>
    %c0_53 = arith.constant 0 : index
    %c0_54 = arith.constant 0 : index
    %80 = vector.load %arg1[%c0_53, %c0_54] : memref<18x64xf32, #tpu.memory_space<vmem>>, vector<18x64xf32>
    %cst_55 = arith.constant 0.00392156886 : f32
    %81 = vector.broadcast %cst_55 : f32 to vector<18x64xf32>
    %82 = arith.mulf %80, %81 : vector<18x64xf32>
    %cst_56 = arith.constant 0.000000e+00 : f32
    %83 = vector.broadcast %cst_56 : f32 to vector<96x46xf32>
    %c0_57 = arith.constant 0 : index
    %c0_58 = arith.constant 0 : index
    %c0_59 = arith.constant 0 : index
    %84 = vector.load %arg7[%c0_57, %c0_58, %c0_59] : memref<9x96x18xf32, #tpu.memory_space<vmem>>, vector<1x96x18xf32>
    %85 = vector.shape_cast %84 : vector<1x96x18xf32> to vector<96x18xf32>
    %86 = vector.extract_strided_slice %82 {offsets = [0, 0], sizes = [18, 46], strides = [1, 1]} : vector<18x64xf32> to vector<18x46xf32>
    %cst_60 = arith.constant dense<0.000000e+00> : vector<96x46xf32>
    %87 = tpu.matmul %85, %86, %cst_60 {dimension_numbers = #tpu.dot_dimension_numbers<[1], [0], [0], [1], [0, 0, 1, 1], [], []>} : vector<96x18xf32>, vector<18x46xf32>, vector<96x46xf32> -> vector<96x46xf32>
    %88 = arith.addf %83, %87 : vector<96x46xf32>
    %c1_61 = arith.constant 1 : index
    %c0_62 = arith.constant 0 : index
    %c0_63 = arith.constant 0 : index
    %89 = vector.load %arg7[%c1_61, %c0_62, %c0_63] : memref<9x96x18xf32, #tpu.memory_space<vmem>>, vector<1x96x18xf32>
    %90 = vector.shape_cast %89 : vector<1x96x18xf32> to vector<96x18xf32>
    %91 = vector.extract_strided_slice %82 {offsets = [0, 1], sizes = [18, 46], strides = [1, 1]} : vector<18x64xf32> to vector<18x46xf32>
    %cst_64 = arith.constant dense<0.000000e+00> : vector<96x46xf32>
    %92 = tpu.matmul %90, %91, %cst_64 {dimension_numbers = #tpu.dot_dimension_numbers<[1], [0], [0], [1], [0, 0, 1, 1], [], []>} : vector<96x18xf32>, vector<18x46xf32>, vector<96x46xf32> -> vector<96x46xf32>
    %93 = arith.addf %88, %92 : vector<96x46xf32>
    %c2_65 = arith.constant 2 : index
    %c0_66 = arith.constant 0 : index
    %c0_67 = arith.constant 0 : index
    %94 = vector.load %arg7[%c2_65, %c0_66, %c0_67] : memref<9x96x18xf32, #tpu.memory_space<vmem>>, vector<1x96x18xf32>
    %95 = vector.shape_cast %94 : vector<1x96x18xf32> to vector<96x18xf32>
    %96 = vector.extract_strided_slice %82 {offsets = [0, 2], sizes = [18, 46], strides = [1, 1]} : vector<18x64xf32> to vector<18x46xf32>
    %cst_68 = arith.constant dense<0.000000e+00> : vector<96x46xf32>
    %97 = tpu.matmul %95, %96, %cst_68 {dimension_numbers = #tpu.dot_dimension_numbers<[1], [0], [0], [1], [0, 0, 1, 1], [], []>} : vector<96x18xf32>, vector<18x46xf32>, vector<96x46xf32> -> vector<96x46xf32>
    %98 = arith.addf %93, %97 : vector<96x46xf32>
    %c3_69 = arith.constant 3 : index
    %c0_70 = arith.constant 0 : index
    %c0_71 = arith.constant 0 : index
    %99 = vector.load %arg7[%c3_69, %c0_70, %c0_71] : memref<9x96x18xf32, #tpu.memory_space<vmem>>, vector<1x96x18xf32>
    %100 = vector.shape_cast %99 : vector<1x96x18xf32> to vector<96x18xf32>
    %101 = vector.extract_strided_slice %82 {offsets = [0, 8], sizes = [18, 46], strides = [1, 1]} : vector<18x64xf32> to vector<18x46xf32>
    %cst_72 = arith.constant dense<0.000000e+00> : vector<96x46xf32>
    %102 = tpu.matmul %100, %101, %cst_72 {dimension_numbers = #tpu.dot_dimension_numbers<[1], [0], [0], [1], [0, 0, 1, 1], [], []>} : vector<96x18xf32>, vector<18x46xf32>, vector<96x46xf32> -> vector<96x46xf32>
    %103 = arith.addf %98, %102 : vector<96x46xf32>
    %c4_73 = arith.constant 4 : index
    %c0_74 = arith.constant 0 : index
    %c0_75 = arith.constant 0 : index
    %104 = vector.load %arg7[%c4_73, %c0_74, %c0_75] : memref<9x96x18xf32, #tpu.memory_space<vmem>>, vector<1x96x18xf32>
    %105 = vector.shape_cast %104 : vector<1x96x18xf32> to vector<96x18xf32>
    %106 = vector.extract_strided_slice %82 {offsets = [0, 9], sizes = [18, 46], strides = [1, 1]} : vector<18x64xf32> to vector<18x46xf32>
    %cst_76 = arith.constant dense<0.000000e+00> : vector<96x46xf32>
    %107 = tpu.matmul %105, %106, %cst_76 {dimension_numbers = #tpu.dot_dimension_numbers<[1], [0], [0], [1], [0, 0, 1, 1], [], []>} : vector<96x18xf32>, vector<18x46xf32>, vector<96x46xf32> -> vector<96x46xf32>
    %108 = arith.addf %103, %107 : vector<96x46xf32>
    %c5_77 = arith.constant 5 : index
    %c0_78 = arith.constant 0 : index
    %c0_79 = arith.constant 0 : index
    %109 = vector.load %arg7[%c5_77, %c0_78, %c0_79] : memref<9x96x18xf32, #tpu.memory_space<vmem>>, vector<1x96x18xf32>
    %110 = vector.shape_cast %109 : vector<1x96x18xf32> to vector<96x18xf32>
    %111 = vector.extract_strided_slice %82 {offsets = [0, 10], sizes = [18, 46], strides = [1, 1]} : vector<18x64xf32> to vector<18x46xf32>
    %cst_80 = arith.constant dense<0.000000e+00> : vector<96x46xf32>
    %112 = tpu.matmul %110, %111, %cst_80 {dimension_numbers = #tpu.dot_dimension_numbers<[1], [0], [0], [1], [0, 0, 1, 1], [], []>} : vector<96x18xf32>, vector<18x46xf32>, vector<96x46xf32> -> vector<96x46xf32>
    %113 = arith.addf %108, %112 : vector<96x46xf32>
    %c6_81 = arith.constant 6 : index
    %c0_82 = arith.constant 0 : index
    %c0_83 = arith.constant 0 : index
    %114 = vector.load %arg7[%c6_81, %c0_82, %c0_83] : memref<9x96x18xf32, #tpu.memory_space<vmem>>, vector<1x96x18xf32>
    %115 = vector.shape_cast %114 : vector<1x96x18xf32> to vector<96x18xf32>
    %116 = vector.extract_strided_slice %82 {offsets = [0, 16], sizes = [18, 46], strides = [1, 1]} : vector<18x64xf32> to vector<18x46xf32>
    %cst_84 = arith.constant dense<0.000000e+00> : vector<96x46xf32>
    %117 = tpu.matmul %115, %116, %cst_84 {dimension_numbers = #tpu.dot_dimension_numbers<[1], [0], [0], [1], [0, 0, 1, 1], [], []>} : vector<96x18xf32>, vector<18x46xf32>, vector<96x46xf32> -> vector<96x46xf32>
    %118 = arith.addf %113, %117 : vector<96x46xf32>
    %c7_85 = arith.constant 7 : index
    %c0_86 = arith.constant 0 : index
    %c0_87 = arith.constant 0 : index
    %119 = vector.load %arg7[%c7_85, %c0_86, %c0_87] : memref<9x96x18xf32, #tpu.memory_space<vmem>>, vector<1x96x18xf32>
    %120 = vector.shape_cast %119 : vector<1x96x18xf32> to vector<96x18xf32>
    %121 = vector.extract_strided_slice %82 {offsets = [0, 17], sizes = [18, 46], strides = [1, 1]} : vector<18x64xf32> to vector<18x46xf32>
    %cst_88 = arith.constant dense<0.000000e+00> : vector<96x46xf32>
    %122 = tpu.matmul %120, %121, %cst_88 {dimension_numbers = #tpu.dot_dimension_numbers<[1], [0], [0], [1], [0, 0, 1, 1], [], []>} : vector<96x18xf32>, vector<18x46xf32>, vector<96x46xf32> -> vector<96x46xf32>
    %123 = arith.addf %118, %122 : vector<96x46xf32>
    %c8_89 = arith.constant 8 : index
    %c0_90 = arith.constant 0 : index
    %c0_91 = arith.constant 0 : index
    %124 = vector.load %arg7[%c8_89, %c0_90, %c0_91] : memref<9x96x18xf32, #tpu.memory_space<vmem>>, vector<1x96x18xf32>
    %125 = vector.shape_cast %124 : vector<1x96x18xf32> to vector<96x18xf32>
    %126 = vector.extract_strided_slice %82 {offsets = [0, 18], sizes = [18, 46], strides = [1, 1]} : vector<18x64xf32> to vector<18x46xf32>
    %cst_92 = arith.constant dense<0.000000e+00> : vector<96x46xf32>
    %127 = tpu.matmul %125, %126, %cst_92 {dimension_numbers = #tpu.dot_dimension_numbers<[1], [0], [0], [1], [0, 0, 1, 1], [], []>} : vector<96x18xf32>, vector<18x46xf32>, vector<96x46xf32> -> vector<96x46xf32>
    %128 = arith.addf %123, %127 : vector<96x46xf32>
    %c0_93 = arith.constant 0 : index
    %c0_94 = arith.constant 0 : index
    %129 = vector.load %arg8[%c0_93, %c0_94] : memref<96x1xf32, #tpu.memory_space<vmem>>, vector<96x1xf32>
    %130 = vector.broadcast %129 : vector<96x1xf32> to vector<96x46xf32>
    %131 = arith.addf %128, %130 : vector<96x46xf32>
    %cst_95 = arith.constant 0.000000e+00 : f32
    %132 = vector.broadcast %cst_95 : f32 to vector<96x46xf32>
    %133 = arith.maximumf %131, %132 : vector<96x46xf32>
    %cst_96 = arith.constant 0.000000e+00 : f32
    %134 = vector.broadcast %cst_96 : f32 to vector<24x32xf32>
    %135 = vector.extract_strided_slice %133 {offsets = [0, 0], sizes = [24, 46], strides = [1, 1]} : vector<96x46xf32> to vector<24x46xf32>
    %c0_97 = arith.constant 0 : index
    %c0_98 = arith.constant 0 : index
    %c0_99 = arith.constant 0 : index
    %136 = vector.load %arg9[%c0_97, %c0_98, %c0_99] : memref<4x46x32xf32, #tpu.memory_space<vmem>>, vector<1x46x32xf32>
    %137 = vector.shape_cast %136 : vector<1x46x32xf32> to vector<46x32xf32>
    %cst_100 = arith.constant dense<0.000000e+00> : vector<24x32xf32>
    %138 = tpu.matmul %135, %137, %cst_100 {dimension_numbers = #tpu.dot_dimension_numbers<[1], [0], [0], [1], [0, 0, 1, 1], [], []>} : vector<24x46xf32>, vector<46x32xf32>, vector<24x32xf32> -> vector<24x32xf32>
    %139 = arith.addf %134, %138 : vector<24x32xf32>
    %140 = vector.extract_strided_slice %133 {offsets = [24, 0], sizes = [24, 46], strides = [1, 1]} : vector<96x46xf32> to vector<24x46xf32>
    %c1_101 = arith.constant 1 : index
    %c0_102 = arith.constant 0 : index
    %c0_103 = arith.constant 0 : index
    %141 = vector.load %arg9[%c1_101, %c0_102, %c0_103] : memref<4x46x32xf32, #tpu.memory_space<vmem>>, vector<1x46x32xf32>
    %142 = vector.shape_cast %141 : vector<1x46x32xf32> to vector<46x32xf32>
    %cst_104 = arith.constant dense<0.000000e+00> : vector<24x32xf32>
    %143 = tpu.matmul %140, %142, %cst_104 {dimension_numbers = #tpu.dot_dimension_numbers<[1], [0], [0], [1], [0, 0, 1, 1], [], []>} : vector<24x46xf32>, vector<46x32xf32>, vector<24x32xf32> -> vector<24x32xf32>
    %144 = arith.addf %139, %143 : vector<24x32xf32>
    %145 = vector.extract_strided_slice %133 {offsets = [48, 0], sizes = [24, 46], strides = [1, 1]} : vector<96x46xf32> to vector<24x46xf32>
    %c2_105 = arith.constant 2 : index
    %c0_106 = arith.constant 0 : index
    %c0_107 = arith.constant 0 : index
    %146 = vector.load %arg9[%c2_105, %c0_106, %c0_107] : memref<4x46x32xf32, #tpu.memory_space<vmem>>, vector<1x46x32xf32>
    %147 = vector.shape_cast %146 : vector<1x46x32xf32> to vector<46x32xf32>
    %cst_108 = arith.constant dense<0.000000e+00> : vector<24x32xf32>
    %148 = tpu.matmul %145, %147, %cst_108 {dimension_numbers = #tpu.dot_dimension_numbers<[1], [0], [0], [1], [0, 0, 1, 1], [], []>} : vector<24x46xf32>, vector<46x32xf32>, vector<24x32xf32> -> vector<24x32xf32>
    %149 = arith.addf %144, %148 : vector<24x32xf32>
    %150 = vector.extract_strided_slice %133 {offsets = [72, 0], sizes = [24, 46], strides = [1, 1]} : vector<96x46xf32> to vector<24x46xf32>
    %c3_109 = arith.constant 3 : index
    %c0_110 = arith.constant 0 : index
    %c0_111 = arith.constant 0 : index
    %151 = vector.load %arg9[%c3_109, %c0_110, %c0_111] : memref<4x46x32xf32, #tpu.memory_space<vmem>>, vector<1x46x32xf32>
    %152 = vector.shape_cast %151 : vector<1x46x32xf32> to vector<46x32xf32>
    %cst_112 = arith.constant dense<0.000000e+00> : vector<24x32xf32>
    %153 = tpu.matmul %150, %152, %cst_112 {dimension_numbers = #tpu.dot_dimension_numbers<[1], [0], [0], [1], [0, 0, 1, 1], [], []>} : vector<24x46xf32>, vector<46x32xf32>, vector<24x32xf32> -> vector<24x32xf32>
    %154 = arith.addf %149, %153 : vector<24x32xf32>
    %c0_113 = arith.constant 0 : index
    %c0_114 = arith.constant 0 : index
    %155 = vector.load %arg10[%c0_113, %c0_114] : memref<1x32xf32, #tpu.memory_space<vmem>>, vector<1x32xf32>
    %156 = vector.broadcast %155 : vector<1x32xf32> to vector<24x32xf32>
    %157 = arith.addf %154, %156 : vector<24x32xf32>
    %cst_115 = arith.constant 0.000000e+00 : f32
    %158 = vector.broadcast %cst_115 : f32 to vector<24x32xf32>
    %159 = arith.maximumf %157, %158 : vector<24x32xf32>
    %160 = vector.extract_strided_slice %79 {offsets = [0, 0], sizes = [2, 32], strides = [1, 1]} : vector<8x32xf32> to vector<2x32xf32>
    %c0_116 = arith.constant 0 : index
    %c0_117 = arith.constant 0 : index
    %161 = vector.load %arg11[%c0_116, %c0_117] : memref<32x128xf32, #tpu.memory_space<vmem>>, vector<32x128xf32>
    %cst_118 = arith.constant dense<0.000000e+00> : vector<2x128xf32>
    %162 = tpu.matmul %160, %161, %cst_118 {dimension_numbers = #tpu.dot_dimension_numbers<[1], [0], [0], [1], [0, 0, 1, 1], [], []>} : vector<2x32xf32>, vector<32x128xf32>, vector<2x128xf32> -> vector<2x128xf32>
    %163 = vector.extract_strided_slice %159 {offsets = [0, 0], sizes = [2, 32], strides = [1, 1]} : vector<24x32xf32> to vector<2x32xf32>
    %c0_119 = arith.constant 0 : index
    %c0_120 = arith.constant 0 : index
    %c0_121 = arith.constant 0 : index
    %164 = vector.load %arg12[%c0_119, %c0_120, %c0_121] : memref<3x32x128xf32, #tpu.memory_space<vmem>>, vector<1x32x128xf32>
    %165 = vector.shape_cast %164 : vector<1x32x128xf32> to vector<32x128xf32>
    %cst_122 = arith.constant dense<0.000000e+00> : vector<2x128xf32>
    %166 = tpu.matmul %163, %165, %cst_122 {dimension_numbers = #tpu.dot_dimension_numbers<[1], [0], [0], [1], [0, 0, 1, 1], [], []>} : vector<2x32xf32>, vector<32x128xf32>, vector<2x128xf32> -> vector<2x128xf32>
    %167 = arith.addf %162, %166 : vector<2x128xf32>
    %168 = vector.extract_strided_slice %159 {offsets = [8, 0], sizes = [2, 32], strides = [1, 1]} : vector<24x32xf32> to vector<2x32xf32>
    %c1_123 = arith.constant 1 : index
    %c0_124 = arith.constant 0 : index
    %c0_125 = arith.constant 0 : index
    %169 = vector.load %arg12[%c1_123, %c0_124, %c0_125] : memref<3x32x128xf32, #tpu.memory_space<vmem>>, vector<1x32x128xf32>
    %170 = vector.shape_cast %169 : vector<1x32x128xf32> to vector<32x128xf32>
    %cst_126 = arith.constant dense<0.000000e+00> : vector<2x128xf32>
    %171 = tpu.matmul %168, %170, %cst_126 {dimension_numbers = #tpu.dot_dimension_numbers<[1], [0], [0], [1], [0, 0, 1, 1], [], []>} : vector<2x32xf32>, vector<32x128xf32>, vector<2x128xf32> -> vector<2x128xf32>
    %172 = arith.addf %167, %171 : vector<2x128xf32>
    %173 = vector.extract_strided_slice %159 {offsets = [16, 0], sizes = [2, 32], strides = [1, 1]} : vector<24x32xf32> to vector<2x32xf32>
    %c2_127 = arith.constant 2 : index
    %c0_128 = arith.constant 0 : index
    %c0_129 = arith.constant 0 : index
    %174 = vector.load %arg12[%c2_127, %c0_128, %c0_129] : memref<3x32x128xf32, #tpu.memory_space<vmem>>, vector<1x32x128xf32>
    %175 = vector.shape_cast %174 : vector<1x32x128xf32> to vector<32x128xf32>
    %cst_130 = arith.constant dense<0.000000e+00> : vector<2x128xf32>
    %176 = tpu.matmul %173, %175, %cst_130 {dimension_numbers = #tpu.dot_dimension_numbers<[1], [0], [0], [1], [0, 0, 1, 1], [], []>} : vector<2x32xf32>, vector<32x128xf32>, vector<2x128xf32> -> vector<2x128xf32>
    %177 = arith.addf %172, %176 : vector<2x128xf32>
    %c0_131 = arith.constant 0 : index
    %c0_132 = arith.constant 0 : index
    %178 = vector.load %arg2[%c0_131, %c0_132] : memref<2x15xf32, #tpu.memory_space<vmem>>, vector<2x15xf32>
    %c0_133 = arith.constant 0 : index
    %c0_134 = arith.constant 0 : index
    %179 = vector.load %arg13[%c0_133, %c0_134] : memref<15x128xf32, #tpu.memory_space<vmem>>, vector<15x128xf32>
    %cst_135 = arith.constant dense<0.000000e+00> : vector<2x128xf32>
    %180 = tpu.matmul %178, %179, %cst_135 {dimension_numbers = #tpu.dot_dimension_numbers<[1], [0], [0], [1], [0, 0, 1, 1], [], []>} : vector<2x15xf32>, vector<15x128xf32>, vector<2x128xf32> -> vector<2x128xf32>
    %181 = arith.addf %177, %180 : vector<2x128xf32>
    %c0_136 = arith.constant 0 : index
    %c0_137 = arith.constant 0 : index
    %182 = vector.load %arg14[%c0_136, %c0_137] : memref<1x128xf32, #tpu.memory_space<vmem>>, vector<1x128xf32>
    %183 = vector.broadcast %182 : vector<1x128xf32> to vector<2x128xf32>
    %184 = arith.addf %181, %183 : vector<2x128xf32>
    %cst_138 = arith.constant 0.000000e+00 : f32
    %185 = vector.broadcast %cst_138 : f32 to vector<2x128xf32>
    %186 = arith.maximumf %184, %185 : vector<2x128xf32>
    %c0_139 = arith.constant 0 : index
    %c0_140 = arith.constant 0 : index
    %187 = vector.load %arg15[%c0_139, %c0_140] : memref<128x128xf32, #tpu.memory_space<vmem>>, vector<128x128xf32>
    %cst_141 = arith.constant dense<0.000000e+00> : vector<2x128xf32>
    %188 = tpu.matmul %186, %187, %cst_141 {dimension_numbers = #tpu.dot_dimension_numbers<[1], [0], [0], [1], [0, 0, 1, 1], [], []>} : vector<2x128xf32>, vector<128x128xf32>, vector<2x128xf32> -> vector<2x128xf32>
    %c0_142 = arith.constant 0 : index
    %c0_143 = arith.constant 0 : index
    %189 = vector.load %arg16[%c0_142, %c0_143] : memref<1x128xf32, #tpu.memory_space<vmem>>, vector<1x128xf32>
    %190 = vector.broadcast %189 : vector<1x128xf32> to vector<2x128xf32>
    %191 = arith.addf %188, %190 : vector<2x128xf32>
    %cst_144 = arith.constant 0.000000e+00 : f32
    %192 = vector.broadcast %cst_144 : f32 to vector<2x128xf32>
    %193 = arith.maximumf %191, %192 : vector<2x128xf32>
    %c0_145 = arith.constant 0 : index
    %c0_146 = arith.constant 0 : index
    %194 = vector.load %arg17[%c0_145, %c0_146] : memref<128x1xf32, #tpu.memory_space<vmem>>, vector<128x1xf32>
    %cst_147 = arith.constant dense<0.000000e+00> : vector<2x1xf32>
    %195 = tpu.matmul %193, %194, %cst_147 {dimension_numbers = #tpu.dot_dimension_numbers<[1], [0], [0], [1], [0, 0, 1, 1], [], []>} : vector<2x128xf32>, vector<128x1xf32>, vector<2x1xf32> -> vector<2x1xf32>
    %c0_148 = arith.constant 0 : index
    %c0_149 = arith.constant 0 : index
    %196 = vector.load %arg18[%c0_148, %c0_149] : memref<1x1xf32, #tpu.memory_space<vmem>>, vector<1x1xf32>
    %197 = vector.broadcast %196 : vector<1x1xf32> to vector<2x1xf32>
    %198 = arith.addf %195, %197 : vector<2x1xf32>
    %c0_150 = arith.constant 0 : index
    %c0_151 = arith.constant 0 : index
    %199 = vector.load %arg19[%c0_150, %c0_151] : memref<2x1xf32, #tpu.memory_space<vmem>>, vector<2x1xf32>
    tpu.vector_store %arg19[%c0_150, %c0_151], %198 {strides = array<i32>} : memref<2x1xf32, #tpu.memory_space<vmem>>, vector<2x1xf32>,
    return
  }
}

</mosaic_0001>

<bundles_post_ra>
// kernel: tpu_custom_call.1
= control target key start
LH: loop header
LB: loop body
LE: loop exit
PB: predicated region body
PF: predicated region fallthrough
CT: control target
= control target key end

     0   :  { %s3399_s21 = smov 126   ;;  %s3401_s23 = smov 112   ;;  %vm98_vm0 = vcmask 1045504   ;;  %vm85_vm1 = vcmask 48128   ;;  %vm337_vm2 = vcmask 916480   ;;  %vm83_vm3 = vcmask 1039360   ;;  %s5251_s0 = inlined_call_operand.vmem [shape: f32[6,256], index: 0, kind: input, shape index: {}]   ;;  %s5252_s3 = inlined_call_operand.vmem [shape: f32[9,32,6], index: 3, kind: input, shape index: {}]   ;;  %s5253_s4 = inlined_call_operand.vmem [shape: f32[32,1], index: 4, kind: input, shape index: {}]   ;;  %s5254_s1 = inlined_call_operand.vmem [shape: f32[18,64], index: 1, kind: input, shape index: {}]   ;;  %s5255_s8 = inlined_call_operand.vmem [shape: f32[96,1], index: 8, kind: input, shape index: {}]   ;;  %s5256_s5 = inlined_call_operand.vmem [shape: f32[4,222,32], index: 5, kind: input, shape index: {}]   ;;  %s5257_s7 = inlined_call_operand.vmem [shape: f32[9,96,18], index: 7, kind: input, shape index: {}]   ;;  %s5258_s6 = inlined_call_operand.vmem [shape: f32[1,32], index: 6, kind: input, shape index: {}]   ;;  %s5259_s9 = inlined_call_operand.vmem [shape: f32[4,46,32], index: 9, kind: input, shape index: {}]   ;;  %s5260_s11 = inlined_call_operand.vmem [shape: f32[32,128], index: 11, kind: input, shape index: {}]   ;;  %s5261_s10 = inlined_call_operand.vmem [shape: f32[1,32], index: 10, kind: input, shape index: {}]   ;;  %s5262_s12 = inlined_call_operand.vmem [shape: f32[3,32,128], index: 12, kind: input, shape index: {}]   ;;  %s5263_s13 = inlined_call_operand.vmem [shape: f32[15,128], index: 13, kind: input, shape index: {}]   ;;  %s5264_s2 = inlined_call_operand.vmem [shape: f32[2,15], index: 2, kind: input, shape index: {}]   ;;  %s5265_s15 = inlined_call_operand.vmem [shape: f32[128,128], index: 15, kind: input, shape index: {}]   ;;  %s5266_s14 = inlined_call_operand.vmem [shape: f32[1,128], index: 14, kind: input, shape index: {}]   ;;  %s5267_s16 = inlined_call_operand.vmem [shape: f32[1,128], index: 16, kind: input, shape index: {}]   ;;  %s5268_s17 = inlined_call_operand.vmem [shape: f32[128,1], index: 17, kind: input, shape index: {}]   ;;  %s5269_s18 = inlined_call_operand.<no memory space> [shape: f32[1,1], index: 18, kind: input, shape index: {}]   ;;  %s5270_s19 = inlined_call_operand.vmem [shape: f32[2,1], index: 19, kind: output, shape index: {}]  }
   0x1   :  { %5275 = sst [smem:[#allocation3_spill]] %s5251_s0  ;;  %s3402_s28 = smov 111   ;;  %vm244_vm4 = vcmask 1031168   ;;  %vm430_vm5 = vcmask 908288   ;;  %v3407_v25 = vmov 0   ;;  %vm523_vm6 = vcmask 900096  }
   0x2   :  { %5276 = sst [smem:[#allocation4_spill]] %s5252_s3  ;;  %s3400_s3 = smov 127   ;;  %3351 = vset.pattern.permute.xlu1 %v3407_v25  ;;  %3358 = vset.pattern.permute.xlu0 %v3407_v25  ;;  %vm616_vm7 = vcmask 785408   ;;  %vm709_vm8 = vcmask 777216   ;;  %vm802_vm9 = vcmask 769024   ;;  %vm1312_vm10 = vcmask 1041408  }
   0x3   :  { %5277 = sst [smem:[#allocation5_spill]] %s5253_s4  ;;  %s3403_s29 = smov 110   ;;  %3357 = vset.pattern.permute.xlu2 %v3407_v25  ;;  %vm1275_vm11 = vcmask 146432   ;;  %vm2436_vm12 = vcmask 375808   ;;  %vm2627_vm13 = vcmask 261120   ;;  %vm2739_vm14 = vcmask 1046528  }
   0x4   :  { %5278 = sst [smem:[#allocation6_spill]] %s5254_s1  ;;  %s3404_s0 = smov 96   ;;  %vm2735_vm15 = vcmask 121856  }
   0x5   :  { %s5279_s20 = sld [smem:[#allocation3_spill]]  ;;  %s3405_s30 = smov 95  }
   0x6   :  { %s5280_s1 = sld [smem:[#allocation4_spill]]  ;;  %s3408_s25 = smov 120  }
   0x7   :  { %s5281_s22 = sld [smem:[#allocation5_spill]]  ;;  %s3410_s4 = smov 118  }
   0xb   :  { %v64_v0 = vld [vmem:[%s5279_s20] sm:$0x3f]  ;;  %v65_v2 = vld [vmem:[%s5279_s20 + $0x8] sm:$0x3f]  ;;  %s3406_s20 = smov 94  }
   0xc   :  { %v66_v1 = vmul.f32 0.003921569, %v64_v0  ;;  %v67_v3 = vmul.f32 0.003921569, %v65_v2  ;;  %v68_v4 = vld [vmem:[%s5280_s1] sm:$0xff]  ;;  %v69_v5 = vld [vmem:[%s5280_s1 + $0x8] sm:$0xff] }
   0xd   :  { %v70_v6 = vld [vmem:[%s5280_s1 + $0x10] sm:$0xff]  ;;  %v71_v7 = vld [vmem:[%s5280_s1 + $0x18] sm:$0xff]  ;;  %v2895_v10 = vld [vmem:[%s5280_s1 + $0x60] sm:$0xff] }
   0xe   :  { %240 = vrot.lane.b32.xlu1 %v66_v1, %s3399_s21  ;;  %79 = vrot.lane.b32.xlu0 %v66_v1, %s3400_s3  ;;  %v2896_v12 = vld [vmem:[%s5280_s1 + $0x68] sm:$0xff]  ;;  %v2897_v15 = vld [vmem:[%s5280_s1 + $0x70] sm:$0xff] }
   0xf   :  { %333 = vrot.lane.b32.xlu2 %v66_v1, %s3401_s23  ;;  %2871 = vmatpush.msk.msra.mxu2 %vm98_vm0, %v66_v1  ;;  %v3569_v18 = vld [vmem:[%s5280_s1 + $0x20] sm:$0xff]  ;;  %v3574_v19 = vld [vmem:[%s5280_s1 + $0x28] sm:$0xff]  ;;  %v2898_v22 = vld [vmem:[%s5280_s1 + $0x78] sm:$0xff] }
  0x10   :  { %2872 = vmatmul.msk.f32.vlgmr.msra.gmra.mxu2 %vm85_vm1, %v68_v4  ;;  %2876 = vmatpush.msk.msra.mxu3 %vm98_vm0, %v67_v3  ;;  %v886_v23 = vld [vmem:[%s5281_s22] sm:$0xff]  ;;  %v3596_v28 = vld [vmem:[%s5280_s1 + $0x30] sm:$0xff]  ;;  %v887_v31 = vld [vmem:[%s5281_s22 + $0x8] sm:$0xff] }
  0x11   :  { %2877 = vmatmul.msk.f32.vlgmr.msra.gmra.mxu3 %vm85_vm1, %v68_v4  ;;  %v3601_v29 = vld [vmem:[%s5280_s1 + $0x40] sm:$0xff]  ;;  %v3616_v33 = vld [vmem:[%s5280_s1 + $0x38] sm:$0xff]  ;;  %v3621_v34 = vld [vmem:[%s5280_s1 + $0x48] sm:$0xff] }
  0x12   :  { %v2923_v38 = vld [vmem:[%s5280_s1 + $0xa0] sm:$0xff]  ;;  %v3658_v47 = vld [vmem:[%s5280_s1 + $0x50] sm:$0xff]  ;;  %v2924_v48 = vld [vmem:[%s5280_s1 + $0xa8] sm:$0xff] }
  0x13   :  { %v889_v51 = vld [vmem:[%s5281_s22 + $0x18] sm:$0xff]  ;;  %v2925_v54 = vld [vmem:[%s5280_s1 + $0xb0] sm:$0xff]  ;;  %v2909_v57 = vld [vmem:[%s5280_s1 + $0x80] sm:$0xff] }
  0x14   :  { %v3684_v53 = vld [vmem:[%s5280_s1 + $0x58] sm:$0xff]  ;;  %v2910_v60 = vld [vmem:[%s5280_s1 + $0x88] sm:$0xff]  ;;  %v2951_v61 = vld [vmem:[%s5280_s1 + $0xe0] sm:$0xff] }
  0x15   :  { %v2926_v58 = vld [vmem:[%s5280_s1 + $0xb8] sm:$0xff]  ;;  %v2911_v62 = vld [vmem:[%s5280_s1 + $0x90] sm:$0xff]  ;;  %v2952_v63 = vld [vmem:[%s5280_s1 + $0xe8] sm:$0xff] }
  0x16   :  { %242 = vrot.lane.b32.xlu1 %v67_v3, %s3399_s21  ;;  %81 = vrot.lane.b32.xlu0 %v67_v3, %s3400_s3  ;;  %v2331_v0 = vld [vmem:[%s5255_s8 + $0x20] sm:$0xff]  ;;  %v2953_v2 = vld [vmem:[%s5280_s1 + $0xf0] sm:$0xff] }
  0x17   :  { %335 = vrot.lane.b32.xlu2 %v67_v3, %s3401_s23  ;;  %v2336_v4 = vld [vmem:[%s5255_s8 + $0x48] sm:$0xff] }
  0x18   :  { %2873 = vmatmul.msk.f32.gmra.mxu2 %vm85_vm1, %v69_v5 }
  0x19   :  { %2878 = vmatmul.msk.f32.gmra.mxu3 %vm85_vm1, %v69_v5  ;;  %v2937_v5 = vld [vmem:[%s5280_s1 + $0xc0] sm:$0xff] }
  0x1e   :  { %428 = vrot.lane.b32.xlu1 %v67_v3, %s3402_s28  ;;  %426 = vrot.lane.b32.xlu0 %v66_v1, %s3402_s28 }
  0x1f   :  { %519 = vrot.lane.b32.xlu2 %v66_v1, %s3403_s29 }
  0x20   :  { %2874 = vmatmul.msk.f32.gmra.mxu2 %vm85_vm1, %v70_v6 }
  0x21   :  { %2879 = vmatmul.msk.f32.gmra.mxu3 %vm85_vm1, %v70_v6  ;;  %v2954_v6 = vld [vmem:[%s5280_s1 + $0xf8] sm:$0xff] }
  0x26   :  { %521 = vrot.lane.b32.xlu0 %v67_v3, %s3403_s29  ;;  %612 = vrot.lane.b32.xlu1 %v66_v1, %s3404_s0 }
  0x27   :  { %614 = vrot.lane.b32.xlu2 %v67_v3, %s3404_s0 }
  0x28   :  { %2875 = vmatmul.msk.f32.gmra.mxu2 %vm85_vm1, %v71_v7 }
  0x29   :  { %2880 = vmatmul.msk.f32.gmra.mxu3 %vm85_vm1, %v71_v7  ;;  %v2333_v7 = vld [vmem:[%s5255_s8 + $0x30] sm:$0xff] }
  0x2e   :  { %707 = vrot.lane.b32.xlu1 %v67_v3, %s3405_s30  ;;  %705 = vrot.lane.b32.xlu0 %v66_v1, %s3405_s30  ;;  %s5282_s30 = sld [smem:[#allocation6_spill]] }
  0x2f   :  { %798 = vrot.lane.b32.xlu2 %v66_v1, %s3406_s20  ;;  %v2912_v1 = vld [vmem:[%s5280_s1 + $0x98] sm:$0xff] }
  0x34   :  { %v1233_v40 = vld [vmem:[%s5282_s30] sm:$0xff]  ;;  %v1234_v41 = vld [vmem:[%s5282_s30 + $0x8] sm:$0xff]  ;;  %v1235_v44 = vld [vmem:[%s5282_s30 + $0x10] sm:$0x3]  ;;  %s3409_s30 = smov 119  }
  0x35   :  { %v3641_v42 = vmul.f32 0.003921569, %v1233_v40  ;;  %v3643_v43 = vmul.f32 0.003921569, %v1234_v41  ;;  %v3653_v46 = vmul.f32 0.003921569, %v1235_v44 }
  0x36   :  { %800 = vrot.lane.b32.xlu0 %v67_v3, %s3406_s20  ;;  %892 = vperm.xlu1 %3351, %v886_v23   ;;  %v2332_v3 = vld [vmem:[%s5255_s8 + $0x28] sm:$0xff]  ;;  %v941_v41 = vld [vmem:[%s5256_s5 + $0x78] sm:$0xff] }
  0x37   :  { %v3651_v45 = vpack.i.bf16 %v3641_v42, %v3643_v43  ;;  %1271 = vrot.lane.b32.xlu2 %v3653_v46, %s3400_s3  ;;  %v2328_v40 = vld [vmem:[%s5255_s8 + $0x8] sm:$0xff] }
  0x3e   :  { %897 = vperm.xlu1 %3351, %v887_v31   ;;  %3353 = vrot.lane.b32.xlu0 %v3651_v45, %s3400_s3 }
  0x46   :  { %1476 = vrot.lane.b32.xlu1 %v3653_v46, %s3399_s21  ;;  %907 = vperm.xlu0 %3358, %v889_v51   ;;  %v2330_v51 = vld [vmem:[%s5255_s8 + $0x18] sm:$0xff] }
  0x4e   :  { %1600 = vrot.lane.b32.xlu1 %v3653_v46, %s3408_s25  ;;  %1724 = vrot.lane.b32.xlu0 %v3653_v46, %s3409_s30 }
  0x56   :  { %3370 = vrot.lane.b32.xlu1 %v3651_v45, %s3409_s30  ;;  %3375 = vrot.lane.b32.xlu0 %v3651_v45, %s3401_s23 }
  0x5e   :  { %2096 = vrot.lane.b32.xlu1 %v3653_v46, %s3402_s28  ;;  %3380 = vrot.lane.b32.xlu0 %v3651_v45, %s3402_s28 }
  0x66   :  { %3385 = vrot.lane.b32.xlu1 %v3651_v45, %s3410_s4  ;;  %3390 = vrot.lane.b32.xlu0 %v3651_v45, %s3403_s29 }
  0x69   :  { %v334_v8 = vpop.permute.xlu2 %333 }
  0x6e   :  { %2361 = vperm.xlu1 %3351, %v2331_v0   ;;  %2366 = vperm.xlu0 %3358, %v2332_v3   ;;  %v2989_v0 = vld [vmem:[%s5256_s5 + $0x130] sm:$0xff]  ;;  %v933_v3 = vld [vmem:[%s5256_s5 + $0x38] sm:$0xff] }
  0x71   :  { %v336_v9 = vpop.permute.xlu2 %335 }
  0x72   :  { %v338_v11 = vsel %vm337_vm2, %v334_v8, %v336_v9  ;;  %2904 = vmatpush.msk.msrb.mxu3 %vm98_vm0, %v336_v9  ;;  %v2337_v8 = vld [vmem:[%s5255_s8 + $0x50] sm:$0xff]  ;;  %v2938_v9 = vld [vmem:[%s5280_s1 + $0xc8] sm:$0xff] }
  0x73   :  { %2899 = vmatpush.msk.msrb.mxu2 %vm98_vm0, %v338_v11  ;;  %2905 = vmatmul.msk.f32.vlgmr.msrb.gmra.mxu3 %vm85_vm1, %v2895_v10  ;;  %v2334_v11 = vld [vmem:[%s5255_s8 + $0x38] sm:$0xff] }
  0x74   :  { %2900 = vmatmul.msk.f32.vlgmr.msrb.gmra.mxu2 %vm85_vm1, %v2895_v10  ;;  %v2329_v10 = vld [vmem:[%s5255_s8 + $0x10] sm:$0xff] }
  0x76   :  { %2386 = vperm.xlu1 %3351, %v2336_v4   ;;  %2371 = vperm.xlu0 %3358, %v2333_v7   ;;  %v2988_v4 = vld [vmem:[%s5256_s5 + $0x128] sm:$0xff] }
  0x79   :  { %v520_v24 = vpop.permute.xlu2 %519 }
  0x7b   :  { %2906 = vmatmul.msk.f32.gmra.mxu3 %vm85_vm1, %v2896_v12 }
  0x7c   :  { %2901 = vmatmul.msk.f32.gmra.mxu2 %vm85_vm1, %v2896_v12  ;;  %v2939_v12 = vld [vmem:[%s5280_s1 + $0xd0] sm:$0xff] }
  0x7e   :  { %2391 = vperm.xlu1 %3351, %v2337_v8   ;;  %2351 = vperm.xlu0 %3358, %v2329_v10   ;;  %v2987_v8 = vld [vmem:[%s5256_s5 + $0x120] sm:$0xff]  ;;  %v2986_v10 = vld [vmem:[%s5256_s5 + $0x118] sm:$0xff] }
  0x80   :  { %v241_v13 = vpop.permute.xlu1 %240  ;;  %v80_v14 = vpop.permute.xlu0 %79 }
  0x81   :  { %v3611_v32 = vpop.permute.xlu2 %614 }
  0x83   :  { %2907 = vmatmul.msk.f32.gmra.mxu3 %vm85_vm1, %v2897_v15 }
  0x84   :  { %2902 = vmatmul.msk.f32.gmra.mxu2 %vm85_vm1, %v2897_v15 }
  0x86   :  { %2376 = vperm.xlu1 %3351, %v2334_v11   ;;  %v931_v11 = vld [vmem:[%s5256_s5 + $0x28] sm:$0xff] }
  0x88   :  { %v243_v16 = vpop.permute.xlu1 %242  ;;  %v82_v17 = vpop.permute.xlu0 %81 }
  0x89   :  { %v84_v20 = vsel %vm83_vm3, %v80_v14, %v82_v17  ;;  %v245_v21 = vsel %vm244_vm4, %v241_v13, %v243_v16  ;;  %v799_v55 = vpop.permute.xlu2 %798  ;;  %v2335_v13 = vld [vmem:[%s5255_s8 + $0x40] sm:$0xff]  ;;  %v2940_v14 = vld [vmem:[%s5280_s1 + $0xd8] sm:$0xff] }
  0x8a   :  { %2861 = vmatpush.msk.msra.mxu0 %vm98_vm0, %v84_v20  ;;  %3332 = vmatpush.msk.msra.mxu1 %vm98_vm0, %v84_v20  ;;  %v2967_v20 = vld [vmem:[%s5280_s1 + $0x110] sm:$0xff] }
  0x8b   :  { %2862 = vmatmul.msk.f32.vlgmr.msra.gmra.mxu0 %vm85_vm1, %v3569_v18  ;;  %2863 = vmatmul.msk.f32.vlgmr.msra.gmra.mxu1 %vm85_vm1, %v3574_v19 }
  0x8c   :  { %2866 = vmatpush.msk.msrb.mxu1 %vm98_vm0, %v82_v17  ;;  %2885 = vmatpush.msk.msrb.mxu0 %vm98_vm0, %v245_v21  ;;  %v888_v17 = vld [vmem:[%s5281_s22 + $0x10] sm:$0xff] }
  0x8d   :  { %2903 = vmatmul.msk.f32.gmra.mxu2 %vm85_vm1, %v2898_v22  ;;  %2908 = vmatmul.msk.f32.gmra.mxu3 %vm85_vm1, %v2898_v22 }
  0x8e   :  { %2890 = vmatpush.msk.msra.mxu1 %vm98_vm0, %v243_v16  ;;  %2381 = vperm.xlu0 %3358, %v2335_v13   ;;  %v2965_v16 = vld [vmem:[%s5280_s1 + $0x100] sm:$0xff] }
  0x8f   :  { %902 = vperm.xlu2 %3357, %v888_v17   ;;  %v930_v13 = vld [vmem:[%s5256_s5 + $0x20] sm:$0xff]  ;;  %v2984_v17 = vld [vmem:[%s5256_s5 + $0x108] sm:$0xff] }
  0x90   :  { %v429_v26 = vpop.permute.xlu1 %428  ;;  %v427_v27 = vpop.permute.xlu0 %426 }
  0x91   :  { %v431_v30 = vsel %vm430_vm5, %v427_v27, %v429_v26 }
  0x92   :  { %2913 = vmatpush.msk.msra.mxu0 %vm98_vm0, %v431_v30 }
  0x93   :  { %2864 = vmatmul.msk.f32.gmra.mxu1 %vm85_vm1, %v3596_v28  ;;  %2886 = vmatmul.msk.f32.vlgmr.msrb.gmra.mxu0 %vm85_vm1, %v3601_v29  ;;  %v3813_v15 = vpop.f32.mrf.mxu2 }
  0x94   :  { %v3870_v31 = vpop.f32.mrf.mxu3 }
  0x97   :  { %3360 = vrot.lane.b32.xlu2 %v3651_v45, %s3399_s21 }
  0x98   :  { %v522_v35 = vpop.permute.xlu0 %521  ;;  %v613_v36 = vpop.permute.xlu1 %612 }
  0x99   :  { %v524_v37 = vsel %vm523_vm6, %v520_v24, %v522_v35  ;;  %2932 = vmatpush.msk.msra.mxu3 %vm98_vm0, %v522_v35  ;;  %v617_v39 = vsel %vm616_vm7, %v613_v36, %v3611_v32  ;;  %v2968_v24 = vld [vmem:[%s5280_s1 + $0x118] sm:$0xff]  ;;  %v2327_v35 = vld [vmem:[%s5255_s8] sm:$0xff] }
  0x9a   :  { %2927 = vmatpush.msk.msra.mxu2 %vm98_vm0, %v524_v37  ;;  %2941 = vmatpush.msk.msrb.mxu0 %vm98_vm0, %v617_v39 }
  0x9b   :  { %2865 = vmatmul.msk.f32.gmra.mxu1 %vm85_vm1, %v3616_v33  ;;  %2887 = vmatmul.msk.f32.gmra.mxu0 %vm85_vm1, %v3621_v34 }
  0x9c   :  { %2928 = vmatmul.msk.f32.vlgmr.msra.gmra.mxu2 %vm85_vm1, %v2923_v38  ;;  %2933 = vmatmul.msk.f32.vlgmr.msra.gmra.mxu3 %vm85_vm1, %v2923_v38  ;;  %v3886_v38 = vpop.f32.mrf.mxu3 }
  0x9f   :  { %3365 = vrot.lane.b32.xlu2 %v3651_v45, %s3408_s25 }
  0xa0   :  { %v708_v49 = vpop.permute.xlu1 %707  ;;  %v706_v50 = vpop.permute.xlu0 %705 }
  0xa1   :  { %v710_v52 = vsel %vm709_vm8, %v706_v50, %v708_v49  ;;  %2960 = vmatpush.msk.msrb.mxu3 %vm98_vm0, %v708_v49  ;;  %v2994_v49 = vld [vmem:[%s5256_s5 + $0x158] sm:$0xff]  ;;  %v939_v50 = vld [vmem:[%s5256_s5 + $0x68] sm:$0xff] }
  0xa2   :  { %2955 = vmatpush.msk.msrb.mxu2 %vm98_vm0, %v710_v52  ;;  %v2993_v52 = vld [vmem:[%s5256_s5 + $0x150] sm:$0xff] }
  0xa3   :  { %2867 = vmatmul.msk.f32.vlgmr.msrb.gmra.mxu1 %vm85_vm1, %v3569_v18  ;;  %2888 = vmatmul.msk.f32.gmra.mxu0 %vm85_vm1, %v3658_v47  ;;  %v2966_v18 = vld [vmem:[%s5280_s1 + $0x108] sm:$0xff] }
  0xa4   :  { %2918 = vmatpush.msk.msrb.mxu1 %vm98_vm0, %v429_v26  ;;  %2929 = vmatmul.msk.f32.gmra.mxu2 %vm85_vm1, %v2924_v48 }
  0xa5   :  { %2934 = vmatmul.msk.f32.gmra.mxu3 %vm85_vm1, %v2924_v48  ;;  %v3904_v48 = vpop.f32.mrf.mxu3  ;;  %989 = vmatpush.msra.mxu2 %v2994_v49  ;;  %v928_v49 = vld [vmem:[%s5256_s5 + $0x10] sm:$0xff] }
  0xa7   :  { %1972 = vrot.lane.b32.xlu2 %v3653_v46, %s3401_s23  ;;  %990 = vmatpush.msra.mxu2 %v2993_v52  ;;  %v2982_v52 = vld [vmem:[%s5256_s5 + $0xf8] sm:$0xff] }
  0xa8   :  { %v3696_v56 = vpop.permute.xlu0 %800 }
  0xa9   :  { %v803_v59 = vsel %vm802_vm9, %v799_v55, %v3696_v56  ;;  %v937_v55 = vld [vmem:[%s5256_s5 + $0x58] sm:$0xff] }
  0xab   :  { %2868 = vmatmul.msk.f32.gmra.mxu1 %vm85_vm1, %v3574_v19  ;;  %2889 = vmatmul.msk.f32.gmra.mxu0 %vm85_vm1, %v3684_v53  ;;  %v3826_v19 = vpop.f32.mrf.mxu2 }
  0xac   :  { %2930 = vmatmul.msk.f32.gmra.mxu2 %vm85_vm1, %v2925_v54 }
  0xad   :  { %2935 = vmatmul.msk.f32.gmra.mxu3 %vm85_vm1, %v2925_v54 }
  0xaf   :  { %1848 = vrot.lane.b32.xlu2 %v3653_v46, %s3410_s4 }
  0xb3   :  { %2869 = vmatmul.msk.f32.gmra.mxu1 %vm85_vm1, %v3596_v28  ;;  %2914 = vmatmul.msk.f32.vlgmr.msra.gmra.mxu0 %vm85_vm1, %v2909_v57  ;;  %v3835_v21 = vpop.f32.mrf.mxu2 }
  0xb4   :  { %2931 = vmatmul.msk.f32.gmra.mxu2 %vm85_vm1, %v2926_v58  ;;  %2969 = vmatpush.msk.msra.mxu0 %vm98_vm0, %v803_v59  ;;  %v2991_v59 = vld [vmem:[%s5256_s5 + $0x140] sm:$0xff] }
  0xb5   :  { %2936 = vmatmul.msk.f32.gmra.mxu3 %vm85_vm1, %v2926_v58 }
  0xb7   :  { %2220 = vrot.lane.b32.xlu2 %v3653_v46, %s3403_s29 }
  0xbb   :  { %2870 = vmatmul.msk.f32.gmra.mxu1 %vm85_vm1, %v3616_v33  ;;  %2915 = vmatmul.msk.f32.gmra.mxu0 %vm85_vm1, %v2910_v60  ;;  %v3850_v25 = vpop.f32.mrf.mxu2 }
  0xbc   :  { %2956 = vmatmul.msk.f32.vlgmr.msrb.gmra.mxu2 %vm85_vm1, %v2951_v61 }
  0xbd   :  { %2961 = vmatmul.msk.f32.vlgmr.msrb.gmra.mxu3 %vm85_vm1, %v2951_v61  ;;  %v2990_v61 = vld [vmem:[%s5256_s5 + $0x138] sm:$0xff] }
  0xbf   :  { %2341 = vperm.xlu2 %3357, %v2327_v35   ;;  %v3026_v35 = vld [vmem:[%s5256_s5 + $0x238] sm:$0xff] }
  0xc3   :  { %2891 = vmatmul.msk.f32.vlgmr.msra.gmra.mxu1 %vm85_vm1, %v3601_v29  ;;  %2916 = vmatmul.msk.f32.gmra.mxu0 %vm85_vm1, %v2911_v62 }
  0xc4   :  { %2946 = vmatpush.msk.msra.mxu1 %vm98_vm0, %v3611_v32  ;;  %2957 = vmatmul.msk.f32.gmra.mxu2 %vm85_vm1, %v2952_v63 }
  0xc5   :  { %2962 = vmatmul.msk.f32.gmra.mxu3 %vm85_vm1, %v2952_v63  ;;  %v2338_v63 = vld [vmem:[%s5255_s8 + $0x58] sm:$0xff] }
  0xc7   :  { %2346 = vperm.xlu2 %3357, %v2328_v40   ;;  %v4003_v40 = vpop.permute.xlu1 %892 }
  0xcb   :  { %2892 = vmatmul.msk.f32.gmra.mxu1 %vm85_vm1, %v3621_v34  ;;  %2917 = vmatmul.msk.f32.gmra.mxu0 %vm85_vm1, %v2912_v1 }
  0xcc   :  { %2958 = vmatmul.msk.f32.gmra.mxu2 %vm85_vm1, %v2953_v2 }
  0xcd   :  { %2963 = vmatmul.msk.f32.gmra.mxu3 %vm85_vm1, %v2953_v2  ;;  %v3956_v2 = vpop.f32.mrf.mxu3 }
  0xcf   :  { %2356 = vperm.xlu2 %3357, %v2330_v51   ;;  %v3025_v51 = vld [vmem:[%s5256_s5 + $0x230] sm:$0xff] }
  0xd3   :  { %2893 = vmatmul.msk.f32.gmra.mxu1 %vm85_vm1, %v3658_v47  ;;  %2942 = vmatmul.msk.f32.vlgmr.msrb.gmra.mxu0 %vm85_vm1, %v2937_v5  ;;  %v940_v47 = vld [vmem:[%s5256_s5 + $0x70] sm:$0xff] }
  0xd4   :  { %2959 = vmatmul.msk.f32.gmra.mxu2 %vm85_vm1, %v2954_v6  ;;  %1035 = vmatpush.msrb.mxu0 %v941_v41 }
  0xd5   :  { %2964 = vmatmul.msk.f32.gmra.mxu3 %vm85_vm1, %v2954_v6 }
  0xd6   :  { %1036 = vmatpush.msrb.mxu0 %v940_v47  ;;  %v2983_v47 = vld [vmem:[%s5256_s5 + $0x100] sm:$0xff] }
  0xd7   :  { %2396 = vperm.xlu2 %3357, %v2338_v63  }
  0xd8   :  { %1037 = vmatpush.msrb.mxu0 %v939_v50  ;;  %v3354_v50 = vpop.permute.xlu0 %3353 }
  0xdb   :  { %2894 = vmatmul.msk.f32.gmra.mxu1 %vm85_vm1, %v3684_v53  ;;  %2943 = vmatmul.msk.f32.gmra.mxu0 %vm85_vm1, %v2938_v9  ;;  %v938_v53 = vld [vmem:[%s5256_s5 + $0x60] sm:$0xff] }
  0xdc   :  { %1038 = vmatpush.msrb.mxu0 %v938_v53  ;;  %v927_v53 = vld [vmem:[%s5256_s5 + $0x8] sm:$0xff] }
  0xde   :  { %1039 = vmatpush.msrb.mxu0 %v937_v55  ;;  %v2981_v55 = vld [vmem:[%s5256_s5 + $0xf0] sm:$0xff] }
  0xe3   :  { %2919 = vmatmul.msk.f32.vlgmr.msrb.gmra.mxu1 %vm85_vm1, %v2909_v57  ;;  %2944 = vmatmul.msk.f32.gmra.mxu0 %vm85_vm1, %v2939_v12 }
  0xe4   :  { %2974 = vmatpush.msk.msrb.mxu1 %vm98_vm0, %v3696_v56  ;;  %v2992_v56 = vld [vmem:[%s5256_s5 + $0x148] sm:$0xff] }
  0xe5   :  { %991 = vmatpush.msra.mxu2 %v2992_v56  ;;  %v926_v56 = vld [vmem:[%s5256_s5] sm:$0xff] }
  0xe7   :  { %992 = vmatpush.msra.mxu2 %v2991_v59  ;;  %v3024_v59 = vld [vmem:[%s5256_s5 + $0x228] sm:$0xff] }
  0xe9   :  { %993 = vmatpush.msra.mxu2 %v2990_v61  ;;  %v3355_v61 = vunpack.i.l.bf16 %v3354_v50 }
  0xeb   :  { %2920 = vmatmul.msk.f32.gmra.mxu1 %vm85_vm1, %v2910_v60  ;;  %2945 = vmatmul.msk.f32.gmra.mxu0 %vm85_vm1, %v2940_v14  ;;  %v936_v60 = vld [vmem:[%s5256_s5 + $0x50] sm:$0xff] }
  0xec   :  { %1040 = vmatpush.msrb.mxu0 %v936_v60  ;;  %994 = vmatpush.msra.mxu2 %v2989_v0  ;;  %v3023_v60 = vld [vmem:[%s5256_s5 + $0x220] sm:$0xff]  ;;  %v3356_v0 = vunpack.i.h.bf16 %v3354_v50 }
  0xee   :  { %995 = vmatpush.msra.mxu2 %v2988_v4  ;;  %v3022_v4 = vld [vmem:[%s5256_s5 + $0x218] sm:$0xff] }
  0xf0   :  { %996 = vmatpush.msra.mxu2 %v2987_v8 }
  0xf2   :  { %997 = vmatpush.msra.mxu2 %v2986_v10  ;;  %v4052_v10 = vpop.permute.xlu1 %897 }
  0xf3   :  { %2921 = vmatmul.msk.f32.gmra.mxu1 %vm85_vm1, %v2911_v62  ;;  %2970 = vmatmul.msk.f32.vlgmr.msra.gmra.mxu0 %vm85_vm1, %v2965_v16  ;;  %v935_v62 = vld [vmem:[%s5256_s5 + $0x48] sm:$0xff] }
  0xf4   :  { %1041 = vmatpush.msrb.mxu0 %v935_v62  ;;  %v2980_v62 = vld [vmem:[%s5256_s5 + $0xe8] sm:$0xff] }
  0xf7   :  { %v3861_v28 = vpop.f32.mrf.mxu2 }
  0xfb   :  { %2922 = vmatmul.msk.f32.gmra.mxu1 %vm85_vm1, %v2912_v1  ;;  %2971 = vmatmul.msk.f32.gmra.mxu0 %vm85_vm1, %v2966_v18  ;;  %v934_v1 = vld [vmem:[%s5256_s5 + $0x40] sm:$0xff] }
  0xfc   :  { %1042 = vmatpush.msrb.mxu0 %v934_v1 }
  0xfe   :  { %1043 = vmatpush.msrb.mxu0 %v933_v3 }
  0xff   :  { %v3876_v34 = vpop.f32.mrf.mxu2 }
 0x103   :  { %2947 = vmatmul.msk.f32.vlgmr.msra.gmra.mxu1 %vm85_vm1, %v2937_v5  ;;  %2972 = vmatmul.msk.f32.gmra.mxu0 %vm85_vm1, %v2967_v20 }
 0x104   :  { %1110 = vmatpush.msra.mxu1 %v3026_v35  ;;  %v3019_v35 = vld [vmem:[%s5256_s5 + $0x200] sm:$0xff] }
 0x106   :  { %1111 = vmatpush.msra.mxu1 %v3025_v51  ;;  %v951_v51 = vld [vmem:[%s5256_s5 + $0xc8] sm:$0xff] }
 0x107   :  { %v3888_v39 = vpop.f32.mrf.mxu2 }
 0x108   :  { %v3841_v22 = vpop.f32.mrf.mxu0  ;;  %v3843_v23 = vpop.f32.mrf.mxu1  ;;  %1112 = vmatpush.msra.mxu1 %v3024_v59  ;;  %v3016_v59 = vld [vmem:[%s5256_s5 + $0x1e8] sm:$0xff] }
 0x10a   :  { %1113 = vmatpush.msra.mxu1 %v3023_v60  ;;  %v195_v60 = vadd.f32 %v3813_v15, %v3841_v22 }
 0x10b   :  { %2948 = vmatmul.msk.f32.gmra.mxu1 %vm85_vm1, %v2938_v9  ;;  %2973 = vmatmul.msk.f32.gmra.mxu0 %vm85_vm1, %v2968_v24  ;;  %v932_v9 = vld [vmem:[%s5256_s5 + $0x30] sm:$0xff] }
 0x10c   :  { %1044 = vmatpush.msrb.mxu0 %v932_v9  ;;  %1114 = vmatpush.msra.mxu1 %v3022_v4  ;;  %v3021_v9 = vld [vmem:[%s5256_s5 + $0x210] sm:$0xff] }
 0x10d   :  { %v948_v4 = vld [vmem:[%s5256_s5 + $0xb0] sm:$0xff] }
 0x10e   :  { %1045 = vmatpush.msrb.mxu0 %v931_v11  ;;  %1115 = vmatpush.msra.mxu1 %v3021_v9  ;;  %v3015_v9 = vld [vmem:[%s5256_s5 + $0x1e0] sm:$0xff] }
 0x110   :  { %v3854_v26 = vpop.f32.mrf.mxu1  ;;  %v3856_v27 = vpop.f32.mrf.mxu0  ;;  %1046 = vmatpush.msrb.mxu0 %v930_v13 }
 0x111   :  { %v3922_v54 = vpop.f32.mrf.mxu2  ;;  %v4059_v13 = vpop.permute.xlu0 %907  ;;  %v320_v15 = vadd.f32 %v3856_v27, %v195_v60  ;;  %v3006_v27 = vld [vmem:[%s5256_s5 + $0x1b8] sm:$0x3f]  ;;  %v198_v60 = vadd.f32 %v3826_v19, %v3843_v23  ;;  %v3011_v19 = vld [vmem:[%s5256_s5 + $0x1c0] sm:$0xff] }
 0x112   :  { %3007 = vmatpush.msk.msra.mxu3 %vm98_vm0, %v3006_v27  ;;  %v3003_v23 = vld [vmem:[%s5256_s5 + $0x1a0] sm:$0xff] }
 0x113   :  { %2949 = vmatmul.msk.f32.gmra.mxu1 %vm85_vm1, %v2939_v12  ;;  %v2985_v12 = vld [vmem:[%s5256_s5 + $0x110] sm:$0xff] }
 0x114   :  { %998 = vmatpush.msra.mxu2 %v2985_v12  ;;  %v3020_v12 = vld [vmem:[%s5256_s5 + $0x208] sm:$0xff] }
 0x115   :  { %1116 = vmatpush.msra.mxu1 %v3020_v12 }
 0x116   :  { %999 = vmatpush.msra.mxu2 %v2984_v17  ;;  %v952_v17 = vld [vmem:[%s5256_s5 + $0xd0] sm:$0xff] }
 0x117   :  { %1117 = vmatpush.msra.mxu1 %v3019_v35 }
 0x118   :  { %v3863_v29 = vpop.f32.mrf.mxu1  ;;  %v3865_v30 = vpop.f32.mrf.mxu0  ;;  %1000 = vmatpush.msra.mxu2 %v2983_v47 }
 0x119   :  { %v4113_v22 = vpop.permute.xlu0 %1724 }
 0x11a   :  { %1001 = vmatpush.msra.mxu2 %v2982_v52  ;;  %v3018_v52 = vld [vmem:[%s5256_s5 + $0x1f8] sm:$0xff] }
 0x11b   :  { %2950 = vmatmul.msk.f32.gmra.mxu1 %vm85_vm1, %v2940_v14  ;;  %v1272_v14 = vpop.permute.xlu2 %1271 }
 0x11c   :  { %1002 = vmatpush.msra.mxu2 %v2981_v55  ;;  %1118 = vmatpush.msra.mxu1 %v3018_v52  ;;  %v3017_v55 = vld [vmem:[%s5256_s5 + $0x1f0] sm:$0xff] }
 0x11d   :  { %v3013_v52 = vld [vmem:[%s5256_s5 + $0x1d0] sm:$0xff] }
 0x11e   :  { %1003 = vmatpush.msra.mxu2 %v2980_v62  ;;  %1119 = vmatpush.msra.mxu1 %v3017_v55  ;;  %v3005_v55 = vld [vmem:[%s5256_s5 + $0x1b0] sm:$0xff] }
 0x11f   :  { %v3964_v5 = vpop.f32.mrf.mxu2  ;;  %1014 = vmatpush.msra.mxu3 %v3005_v55 }
 0x120   :  { %v3872_v32 = vpop.f32.mrf.mxu1  ;;  %v3874_v33 = vpop.f32.mrf.mxu0  ;;  %1120 = vmatpush.msra.mxu1 %v3016_v59  ;;  %v3012_v59 = vld [vmem:[%s5256_s5 + $0x1c8] sm:$0xff] }
 0x121   :  { %v4180_v55 = vpop.permute.xlu0 %3375 }
 0x122   :  { %1121 = vmatpush.msra.mxu1 %v3015_v9  ;;  %v3004_v9 = vld [vmem:[%s5256_s5 + $0x1a8] sm:$0xff] }
 0x123   :  { %2975 = vmatmul.msk.f32.vlgmr.msrb.gmra.mxu1 %vm85_vm1, %v2965_v16  ;;  %v929_v16 = vld [vmem:[%s5256_s5 + $0x18] sm:$0xff]  ;;  %v4037_v63 = vpop.permute.xlu2 %902  ;;  %1015 = vmatpush.msra.mxu3 %v3004_v9 }
 0x124   :  { %1047 = vmatpush.msrb.mxu0 %v929_v16  ;;  %v953_v16 = vld [vmem:[%s5256_s5 + $0xd8] sm:$0x3f] }
 0x125   :  { %1016 = vmatpush.msra.mxu3 %v3003_v23  ;;  %v2998_v23 = vld [vmem:[%s5256_s5 + $0x178] sm:$0xff] }
 0x126   :  { %1048 = vmatpush.msrb.mxu0 %v928_v49 }
 0x127   :  { %v4005_v41 = vpop.f32.mrf.mxu2 }
 0x128   :  { %v3882_v36 = vpop.f32.mrf.mxu1  ;;  %v3884_v37 = vpop.f32.mrf.mxu0  ;;  %1049 = vmatpush.msrb.mxu0 %v927_v53  ;;  %v950_v53 = vld [vmem:[%s5256_s5 + $0xc0] sm:$0xff] }
 0x12a   :  { %1050 = vmatpush.msrb.mxu0 %v926_v56 }
 0x12b   :  { %2976 = vmatmul.msk.f32.gmra.mxu1 %vm85_vm1, %v2966_v18  ;;  %v3994_v18 = vpop.f32.mrf.mxu3  ;;  %v4074_v47 = vpop.permute.xlu2 %3360 }
 0x12c   :  { %3083 = vmatpush.msk.msra.mxu0 %vm1312_vm10, %v1272_v14  ;;  %v2979_v14 = vld [vmem:[%s5256_s5 + $0xe0] sm:$0xff] }
 0x12d   :  { %1004 = vmatpush.msra.mxu2 %v2979_v14 }
 0x12e   :  { %1329 = vmatpush.msra.mxu0 %v3355_v61  ;;  %v4099_v61 = vpop.permute.xlu1 %1476 }
 0x12f   :  { %v4054_v11 = vpop.f32.mrf.mxu2  ;;  %3009 = vmatpush.msk.msrb.mxu2 %vm98_vm0, %v953_v16  ;;  %v947_v16 = vld [vmem:[%s5256_s5 + $0xa8] sm:$0xff] }
 0x130   :  { %v3897_v44 = vpop.f32.mrf.mxu1  ;;  %v3899_v45 = vpop.f32.mrf.mxu0  ;;  %1330 = vmatpush.msra.mxu0 %v3356_v0  ;;  %v949_v0 = vld [vmem:[%s5256_s5 + $0xb8] sm:$0xff] }
 0x131   :  { %1060 = vmatpush.msrb.mxu2 %v952_v17  ;;  %v3014_v17 = vld [vmem:[%s5256_s5 + $0x1d8] sm:$0xff] }
 0x132   :  { %1122 = vmatpush.msra.mxu1 %v3014_v17 }
 0x133   :  { %2977 = vmatmul.msk.f32.gmra.mxu1 %vm85_vm1, %v2967_v20  ;;  %v4047_v8 = vpop.f32.mrf.mxu3  ;;  %1061 = vmatpush.msrb.mxu2 %v951_v51  ;;  %v4125_v35 = vpop.permute.xlu2 %3365  ;;  %v946_v51 = vld [vmem:[%s5256_s5 + $0xa0] sm:$0xff] }
 0x134   :  { %1123 = vmatpush.msra.mxu1 %v3013_v52  ;;  %v943_v52 = vld [vmem:[%s5256_s5 + $0x88] sm:$0xff] }
 0x135   :  { %1062 = vmatpush.msrb.mxu2 %v950_v53  ;;  %v413_v53 = vadd.f32 %v3861_v28, %v320_v15  ;;  %v945_v28 = vld [vmem:[%s5256_s5 + $0x98] sm:$0xff]  ;;  %v944_v15 = vld [vmem:[%s5256_s5 + $0x90] sm:$0xff] }
 0x136   :  { %1124 = vmatpush.msra.mxu1 %v3012_v59  ;;  %v942_v59 = vld [vmem:[%s5256_s5 + $0x80] sm:$0xff] }
 0x137   :  { %v4101_v62 = vpop.f32.mrf.mxu2  ;;  %1063 = vmatpush.msrb.mxu2 %v949_v0  ;;  %v506_v0 = vadd.f32 %v3899_v45, %v413_v53  ;;  %v322_v45 = vadd.f32 %v3865_v30, %v198_v60  ;;  %v3002_v30 = vld [vmem:[%s5256_s5 + $0x198] sm:$0xff] }
 0x138   :  { %v3930_v57 = vpop.f32.mrf.mxu1  ;;  %v3932_v58 = vpop.f32.mrf.mxu0  ;;  %1125 = vmatpush.msra.mxu1 %v3011_v19  ;;  %1017 = vmatpush.msra.mxu3 %v3002_v30  ;;  %v2997_v30 = vld [vmem:[%s5256_s5 + $0x170] sm:$0xff] }
 0x139   :  { %1064 = vmatpush.msrb.mxu2 %v948_v4  ;;  %v599_v53 = vadd.f32 %v3964_v5, %v506_v0  ;;  %v415_v60 = vadd.f32 %v3876_v34, %v322_v45  ;;  %v3001_v0 = vld [vmem:[%s5256_s5 + $0x190] sm:$0xff]  ;;  %v2999_v34 = vld [vmem:[%s5256_s5 + $0x180] sm:$0xff] }
 0x13a   :  { %3096 = vmatpush.msk.msrb.mxu1 %vm1312_vm10, %v3653_v46  ;;  %1018 = vmatpush.msra.mxu3 %v3001_v0 }
 0x13b   :  { %2978 = vmatmul.msk.f32.gmra.mxu1 %vm85_vm1, %v2968_v24  ;;  %v4092_v56 = vpop.f32.mrf.mxu3  ;;  %1065 = vmatpush.msrb.mxu2 %v947_v16  ;;  %v4165_v16 = vpop.permute.xlu1 %1600  ;;  %v508_v9 = vadd.f32 %v3932_v58, %v415_v60 }
 0x13c   :  { %1420 = vmatpush.msrb.mxu1 %v3643_v43  ;;  %v4188_v5 = vpop.permute.xlu2 %1972  ;;  %v3000_v43 = vld [vmem:[%s5256_s5 + $0x188] sm:$0xff] }
 0x13d   :  { %1066 = vmatpush.msrb.mxu2 %v946_v51  ;;  %1019 = vmatpush.msra.mxu3 %v3000_v43 }
 0x13e   :  { %1421 = vmatpush.msrb.mxu1 %v3641_v42 }
 0x13f   :  { %v744_v17 = vpop.f32.mrf.mxu2  ;;  %1067 = vmatpush.msrb.mxu2 %v945_v28  ;;  %v201_v28 = vadd.f32 %v3835_v21, %v3854_v26  ;;  %v601_v26 = vadd.f32 %v4005_v41, %v508_v9  ;;  %1020 = vmatpush.msra.mxu3 %v2999_v34  ;;  %v4218_v41 = vpop.permute.xlu0 %3380 }
 0x140   :  { %v3966_v6 = vpop.f32.mrf.mxu1  ;;  %v3968_v7 = vpop.f32.mrf.mxu0 }
 0x141   :  { %1068 = vmatpush.msrb.mxu2 %v944_v15  ;;  %1021 = vmatpush.msra.mxu3 %v2998_v23  ;;  %v3036_v23 = vld [vmem:[%s5256_s5 + $0x288] sm:$0xff] }
 0x143   :  { %v4147_v4 = vpop.f32.mrf.mxu3  ;;  %1069 = vmatpush.msrb.mxu2 %v943_v52  ;;  %v3371_v45 = vpop.permute.xlu1 %3370  ;;  %1022 = vmatpush.msra.mxu3 %v2997_v30 }
 0x144   :  { %v4224_v0 = vpop.permute.xlu2 %1848  ;;  %v3373_v9 = vunpack.i.h.bf16 %v3371_v45 }
 0x145   :  { %1070 = vmatpush.msrb.mxu2 %v942_v59  ;;  %v2996_v59 = vld [vmem:[%s5256_s5 + $0x168] sm:$0xff] }
 0x146   :  { %1023 = vmatpush.msra.mxu3 %v2996_v59 }
 0x147   :  { %v747_v52 = vpop.f32.mrf.mxu2 }
 0x148   :  { %v3996_v20 = vpop.f32.mrf.mxu1  ;;  %v3998_v24 = vpop.f32.mrf.mxu0 }
 0x14b   :  { %v4204_v19 = vpop.f32.mrf.mxu3 }
 0x150   :  { %v4040_v1 = vpop.f32.mrf.mxu1  ;;  %v4042_v3 = vpop.f32.mrf.mxu0 }
 0x151   :  { %v692_v46 = vadd.f32 %v4042_v3, %v599_v53  ;;  %v324_v3 = vadd.f32 %v3874_v33, %v201_v28 }
 0x153   :  { %v785_v15 = vadd.f32 %v744_v17, %v692_v46  ;;  %v417_v53 = vadd.f32 %v3888_v39, %v324_v3  ;;  %v3372_v39 = vunpack.i.l.bf16 %v3371_v45  ;;  %v750_v45 = vpop.f32.mrf.mxu2 }
 0x155   :  { %v510_v60 = vadd.f32 %v3968_v7, %v417_v53  ;;  %v3038_v7 = vld [vmem:[%s5256_s5 + $0x298] sm:$0x3f] }
 0x157   :  { %v603_v3 = vadd.f32 %v4054_v11, %v510_v60  ;;  %v4248_v11 = vpop.permute.xlu1 %2096  ;;  %v3055_v60 = vld [vmem:[%s5256_s5 + $0x310] sm:$0xff] }
 0x158   :  { %v4076_v49 = vpop.f32.mrf.mxu1  ;;  %v4078_v50 = vpop.f32.mrf.mxu0 }
 0x159   :  { %v694_v33 = vadd.f32 %v4078_v50, %v601_v26  ;;  %v2995_v50 = vld [vmem:[%s5256_s5 + $0x160] sm:$0xff]  ;;  %v3037_v26 = vld [vmem:[%s5256_s5 + $0x290] sm:$0xff] }
 0x15a   :  { %1024 = vmatpush.msra.mxu3 %v2995_v50 }
 0x15b   :  { %v787_v28 = vadd.f32 %v747_v52, %v694_v33  ;;  %v3071_v52 = vld [vmem:[%s5257_s7 + $0x60] sm:$0xff] }
 0x15c   :  { %3039 = vmatpush.msk.msrb.mxu3 %vm98_vm0, %v3038_v7  ;;  %v3035_v33 = vld [vmem:[%s5256_s5 + $0x280] sm:$0xff]  ;;  %v3054_v7 = vld [vmem:[%s5256_s5 + $0x308] sm:$0xff] }
 0x15e   :  { %1135 = vmatpush.msrb.mxu3 %v3037_v26  ;;  %v3053_v26 = vld [vmem:[%s5256_s5 + $0x300] sm:$0xff] }
 0x160   :  { %v4115_v12 = vpop.f32.mrf.mxu1  ;;  %v4117_v14 = vpop.f32.mrf.mxu0  ;;  %1136 = vmatpush.msrb.mxu3 %v3036_v23  ;;  %v3032_v23 = vld [vmem:[%s5256_s5 + $0x268] sm:$0xff] }
 0x162   :  { %1137 = vmatpush.msrb.mxu3 %v3035_v33 }
 0x168   :  { %v4167_v27 = vpop.f32.mrf.mxu1  ;;  %v4169_v51 = vpop.f32.mrf.mxu0 }
 0x170   :  { %v4206_v42 = vpop.f32.mrf.mxu1  ;;  %v837_v21 = vpop.f32.mrf.mxu0 }
 0x171   :  { %v878_v58 = vadd.f32 %v837_v21, %v785_v15  ;;  %v4237_v21 = vpop.f32.mrf.mxu3 }
 0x173   :  { %v910_v17 = vadd.f32 %v4003_v40, %v878_v58  ;;  %v696_v58 = vadd.f32 %v4117_v14, %v603_v3  ;;  %v3056_v14 = vld [vmem:[%s5256_s5 + $0x318] sm:$0xff]  ;;  %v3033_v3 = vld [vmem:[%s5256_s5 + $0x270] sm:$0xff] }
 0x175   :  { %v918_v46 = vmax.f32 %v910_v17, 0.0  ;;  %v3391_v17 = vpop.permute.xlu0 %3390  ;;  %v789_v59 = vadd.f32 %v750_v45, %v696_v58 }
 0x176   :  { %v3392_v30 = vunpack.i.l.bf16 %v3391_v17 }
 0x177   :  { %1051 = vmatmul.f32.vlgmr.msrb.gmra.mxu0 %v918_v46  ;;  %v2221_v46 = vpop.permute.xlu2 %2220 }
 0x178   :  { %v4229_v43 = vpop.f32.mrf.mxu1  ;;  %v840_v34 = vpop.f32.mrf.mxu0  ;;  %3171 = vmatpush.msk.msrb.mxu0 %vm1312_vm10, %v4113_v22 }
 0x179   :  { %v880_v15 = vadd.f32 %v840_v34, %v787_v28  ;;  %v3034_v28 = vld [vmem:[%s5256_s5 + $0x278] sm:$0xff]  ;;  %v4279_v58 = vpop.f32.mrf.mxu3 }
 0x17a   :  { %1780 = vmatpush.msrb.mxu0 %v3372_v39  ;;  %1138 = vmatpush.msrb.mxu3 %v3034_v28  ;;  %v3049_v28 = vld [vmem:[%s5256_s5 + $0x2e0] sm:$0xff] }
 0x17b   :  { %v912_v22 = vadd.f32 %v4052_v10, %v880_v15 }
 0x17c   :  { %1781 = vmatpush.msrb.mxu0 %v3373_v9  ;;  %v3393_v9 = vunpack.i.h.bf16 %v3391_v17  ;;  %1139 = vmatpush.msrb.mxu3 %v3033_v3  ;;  %v3051_v17 = vld [vmem:[%s5256_s5 + $0x2f0] sm:$0xff]  ;;  %v3048_v3 = vld [vmem:[%s5256_s5 + $0x2d8] sm:$0xff] }
 0x17d   :  { %v920_v53 = vmax.f32 %v912_v22, 0.0  ;;  %v3072_v22 = vld [vmem:[%s5257_s7 + $0x68] sm:$0xff] }
 0x17e   :  { %1140 = vmatpush.msrb.mxu3 %v3032_v23  ;;  %v204_v23 = vadd.f32 %v3850_v25, %v3863_v29  ;;  %v1240_v25 = vld [vmem:[%s5257_s7 + $0x8] sm:$0xff]  ;;  %v227_v29 = vadd.f32 %v3886_v38, %v3882_v36 }
 0x17f   :  { %1005 = vmatmul.f32.vlgmr.msra.gmra.mxu2 %v920_v53  ;;  %3084 = vmatmul.msk.f32.vlgmr.msra.gmra.mxu0 %vm1275_vm11, %v3071_v52  ;;  %v3052_v52 = vld [vmem:[%s5256_s5 + $0x2f8] sm:$0xff]  ;;  %v3386_v53 = vpop.permute.xlu1 %3385 }
 0x180   :  { %v4263_v39 = vpop.f32.mrf.mxu1  ;;  %v843_v50 = vpop.f32.mrf.mxu0  ;;  %1186 = vmatpush.msra.mxu2 %v3056_v14  ;;  %3271 = vmatpush.msk.msra.mxu0 %vm1312_vm10, %v2221_v46  ;;  %v3031_v14 = vld [vmem:[%s5256_s5 + $0x260] sm:$0xff]  ;;  %v3387_v33 = vunpack.i.l.bf16 %v3386_v53  ;;  %v3050_v46 = vld [vmem:[%s5256_s5 + $0x2e8] sm:$0xff] }
 0x181   :  { %v882_v34 = vadd.f32 %v843_v50, %v789_v59  ;;  %1141 = vmatpush.msrb.mxu3 %v3031_v14  ;;  %v3030_v59 = vld [vmem:[%s5256_s5 + $0x258] sm:$0xff]  ;;  %v3029_v50 = vld [vmem:[%s5256_s5 + $0x250] sm:$0xff] }
 0x182   :  { %1187 = vmatpush.msra.mxu2 %v3055_v60  ;;  %2276 = vmatpush.msra.mxu0 %v3392_v30  ;;  %v3388_v60 = vunpack.i.h.bf16 %v3386_v53  ;;  %v3045_v53 = vld [vmem:[%s5256_s5 + $0x2c0] sm:$0xff]  ;;  %v3074_v14 = vld [vmem:[%s5257_s7 + $0x78] sm:$0xff] }
 0x183   :  { %v914_v15 = vadd.f32 %v4037_v63, %v882_v34  ;;  %1142 = vmatpush.msrb.mxu3 %v3030_v59  ;;  %v1239_v34 = vld [vmem:[%s5257_s7] sm:$0xff]  ;;  %v3043_v59 = vld [vmem:[%s5256_s5 + $0x2b0] sm:$0xff] }
 0x184   :  { %1188 = vmatpush.msra.mxu2 %v3054_v7  ;;  %2277 = vmatpush.msra.mxu0 %v3393_v9  ;;  %v3073_v9 = vld [vmem:[%s5257_s7 + $0x70] sm:$0xff]  ;;  %v224_v7 = vadd.f32 %v3870_v31, %v3872_v32 }
 0x185   :  { %v922_v45 = vmax.f32 %v914_v15, 0.0  ;;  %1143 = vmatpush.msrb.mxu3 %v3029_v50  ;;  %v3027_v15 = vld [vmem:[%s5256_s5 + $0x240] sm:$0xff]  ;;  %v3047_v31 = vld [vmem:[%s5256_s5 + $0x2d0] sm:$0xff] }
 0x186   :  { %1189 = vmatpush.msra.mxu2 %v3053_v26  ;;  %v4330_v26 = vpop.f32.mrf.mxu3  ;;  %v3041_v50 = vld [vmem:[%s5256_s5 + $0x2a0] sm:$0xff] }
 0x187   :  { %1126 = vmatmul.f32.vlgmr.msra.gmra.mxu1 %v922_v45  ;;  %3085 = vmatmul.msk.f32.gmra.mxu0 %vm1275_vm11, %v3072_v22  ;;  %v321_v22 = vadd.f32 %v3966_v6, %v224_v7  ;;  %v3046_v45 = vld [vmem:[%s5256_s5 + $0x2c8] sm:$0xff]  ;;  %v326_v6 = vadd.f32 %v3884_v37, %v204_v23  ;;  %v753_v7 = vpop.f32.mrf.mxu2 }
 0x188   :  { %v4297_v30 = vpop.f32.mrf.mxu1  ;;  %1190 = vmatpush.msra.mxu2 %v3052_v52  ;;  %3196 = vmatpush.msk.msra.mxu1 %vm1312_vm10, %v4224_v0  ;;  %v3028_v0 = vld [vmem:[%s5256_s5 + $0x248] sm:$0xff] }
 0x189   :  { %1144 = vmatpush.msrb.mxu3 %v3028_v0  ;;  %v414_v52 = vadd.f32 %v3994_v18, %v321_v22  ;;  %v3044_v18 = vld [vmem:[%s5256_s5 + $0x2b8] sm:$0xff] }
 0x18a   :  { %1191 = vmatpush.msra.mxu2 %v3051_v17  ;;  %1904 = vmatpush.msra.mxu1 %v3387_v33  ;;  %v419_v33 = vadd.f32 %v3922_v54, %v326_v6  ;;  %v323_v17 = vadd.f32 %v3996_v20, %v227_v29  ;;  %v3042_v54 = vld [vmem:[%s5256_s5 + $0x2a8] sm:$0xff] }
 0x18b   :  { %1145 = vmatpush.msrb.mxu3 %v3027_v15  ;;  %v507_v37 = vadd.f32 %v4115_v12, %v414_v52  ;;  %v3367_v52 = vunpack.i.l.bf16 %v4125_v35 }
 0x18c   :  { %1192 = vmatpush.msra.mxu2 %v3050_v46  ;;  %1905 = vmatpush.msra.mxu1 %v3388_v60  ;;  %v512_v12 = vadd.f32 %v3998_v24, %v419_v33  ;;  %v416_v20 = vadd.f32 %v4047_v8, %v323_v17  ;;  %v1241_v24 = vld [vmem:[%s5257_s7 + $0x10] sm:$0xff] }
 0x18d   :  { %v600_v60 = vadd.f32 %v4204_v19, %v507_v37  ;;  %v230_v19 = vadd.f32 %v3904_v48, %v3897_v44  ;;  %v846_v44 = vpop.f32.mrf.mxu0  ;;  %v3067_v17 = vld [vmem:[%s5256_s5 + $0x370] sm:$0xff] }
 0x18e   :  { %1193 = vmatpush.msra.mxu2 %v3049_v28  ;;  %v773_v36 = vpop.f32.mrf.mxu3  ;;  %v3075_v28 = vld [vmem:[%s5257_s7 + $0x80] sm:$0xff]  ;;  %v605_v8 = vadd.f32 %v4101_v62, %v512_v12 }
 0x18f   :  { %3086 = vmatmul.msk.f32.gmra.mxu0 %vm1275_vm11, %v3073_v9  ;;  %3097 = vmatmul.msk.f32.vlgmr.msrb.gmra.mxu1 %vm1275_vm11, %v1239_v34  ;;  %v693_v46 = vadd.f32 %v4263_v39, %v600_v60  ;;  %v509_v39 = vadd.f32 %v4167_v27, %v416_v20  ;;  %v325_v9 = vadd.f32 %v4040_v1, %v230_v19  ;;  %v3066_v60 = vld [vmem:[%s5256_s5 + $0x368] sm:$0xff]  ;;  %v3065_v20 = vld [vmem:[%s5256_s5 + $0x360] sm:$0xff] }
 0x190   :  { %v4338_v32 = vpop.f32.mrf.mxu1  ;;  %1194 = vmatpush.msra.mxu2 %v3048_v3  ;;  %v698_v34 = vadd.f32 %v4169_v51, %v605_v8  ;;  %v3076_v51 = vld [vmem:[%s5257_s7 + $0x88] sm:$0xff] }
 0x191   :  { %v786_v0 = vadd.f32 %v773_v36, %v693_v46  ;;  %v602_v15 = vadd.f32 %v4237_v21, %v509_v39  ;;  %v418_v62 = vadd.f32 %v4092_v56, %v325_v9  ;;  %v1242_v21 = vld [vmem:[%s5257_s7 + $0x18] sm:$0xff]  ;;  %v3383_v36 = vunpack.i.h.bf16 %v4218_v41  ;;  %v3062_v19 = vld [vmem:[%s5256_s5 + $0x348] sm:$0xff]  ;;  %v3061_v39 = vld [vmem:[%s5256_s5 + $0x340] sm:$0xff] }
 0x192   :  { %1195 = vmatpush.msra.mxu2 %v3047_v31  ;;  %v791_v27 = vadd.f32 %v753_v7, %v698_v34  ;;  %v3135_v9 = vld [vmem:[%s5257_s7 + $0x128] sm:$0xff]  ;;  %v3079_v7 = vld [vmem:[%s5257_s7 + $0xa0] sm:$0xff] }
 0x193   :  { %v695_v31 = vadd.f32 %v4297_v30, %v602_v15  ;;  %v511_v23 = vadd.f32 %v4206_v42, %v418_v62  ;;  %v233_v30 = vadd.f32 %v3956_v2, %v3930_v57  ;;  %v3068_v57 = vld [vmem:[%s5256_s5 + $0x378] sm:$0x3f]  ;;  %v3077_v2 = vld [vmem:[%s5257_s7 + $0x90] sm:$0xff] }
 0x194   :  { %1196 = vmatpush.msra.mxu2 %v3046_v45  ;;  %v884_v45 = vadd.f32 %v846_v44, %v791_v27  ;;  %v3059_v15 = vld [vmem:[%s5256_s5 + $0x330] sm:$0xff]  ;;  %v3058_v44 = vld [vmem:[%s5256_s5 + $0x328] sm:$0xff] }
 0x195   :  { %v327_v29 = vadd.f32 %v4076_v49, %v233_v30  ;;  %v1243_v49 = vld [vmem:[%s5257_s7 + $0x20] sm:$0xff]  ;;  %v3136_v62 = vld [vmem:[%s5257_s7 + $0x130] sm:$0xff] }
 0x196   :  { %1197 = vmatpush.msra.mxu2 %v3045_v53  ;;  %v776_v48 = vpop.f32.mrf.mxu3  ;;  %v604_v53 = vadd.f32 %v4279_v58, %v511_v23  ;;  %v3382_v58 = vunpack.i.l.bf16 %v4218_v41  ;;  %v3134_v41 = vld [vmem:[%s5257_s7 + $0x120] sm:$0xff]  ;;  %v3377_v23 = vunpack.i.l.bf16 %v4180_v55 }
 0x197   :  { %3087 = vmatmul.msk.f32.gmra.mxu0 %vm1275_vm11, %v3074_v14  ;;  %3098 = vmatmul.msk.f32.gmra.mxu1 %vm1275_vm11, %v1240_v25  ;;  %v788_v56 = vadd.f32 %v776_v48, %v695_v31  ;;  %v916_v14 = vadd.f32 %v4059_v13, %v884_v45  ;;  %v3057_v48 = vld [vmem:[%s5256_s5 + $0x320] sm:$0xff]  ;;  %v3362_v31 = vunpack.i.l.bf16 %v4074_v47 }
 0x198   :  { %v4369_v38 = vpop.f32.mrf.mxu1  ;;  %1198 = vmatpush.msra.mxu2 %v3044_v18  ;;  %v697_v37 = vadd.f32 %v4338_v32, %v604_v53  ;;  %v3109_v45 = vld [vmem:[%s5257_s7 + $0xc0] sm:$0xff]  ;;  %v1249_v53 = vld [vmem:[%s5257_s7 + $0x50] sm:$0xff] }
 0x199   :  { %v924_v33 = vmax.f32 %v916_v14, 0.0  ;;  %v3159_v30 = vld [vmem:[%s5257_s7 + $0x180] sm:$0xff]  ;;  %v3112_v14 = vld [vmem:[%s5257_s7 + $0xd8] sm:$0xff] }
 0x19a   :  { %1199 = vmatpush.msra.mxu2 %v3043_v59 }
 0x19c   :  { %1200 = vmatpush.msra.mxu2 %v3042_v54 }
 0x19e   :  { %1201 = vmatpush.msra.mxu2 %v3041_v50  ;;  %v779_v18 = vpop.f32.mrf.mxu3  ;;  %v1244_v50 = vld [vmem:[%s5257_s7 + $0x28] sm:$0xff] }
 0x19f   :  { %3088 = vmatmul.msk.f32.gmra.mxu0 %vm1275_vm11, %v3075_v28  ;;  %3099 = vmatmul.msk.f32.gmra.mxu1 %vm1275_vm11, %v1241_v24  ;;  %v790_v32 = vadd.f32 %v779_v18, %v697_v37  ;;  %v1250_v37 = vld [vmem:[%s5257_s7 + $0x58] sm:$0xff] }
 0x1a0   :  { %v866_v3 = vpop.f32.mrf.mxu1  ;;  %v3141_v18 = vld [vmem:[%s5257_s7 + $0x158] sm:$0xff] }
 0x1a1   :  { %v879_v22 = vadd.f32 %v866_v3, %v786_v0  ;;  %v3060_v0 = vld [vmem:[%s5256_s5 + $0x338] sm:$0xff]  ;;  %v1245_v3 = vld [vmem:[%s5257_s7 + $0x30] sm:$0xff] }
 0x1a3   :  { %v911_v1 = vadd.f32 %v4003_v40, %v879_v22  ;;  %v3368_v40 = vunpack.i.h.bf16 %v4125_v35 }
 0x1a5   :  { %v919_v6 = vmax.f32 %v911_v1, 0.0  ;;  %v1246_v1 = vld [vmem:[%s5257_s7 + $0x38] sm:$0xff] }
 0x1a6   :  { %v782_v24 = vpop.f32.mrf.mxu3 }
 0x1a7   :  { %3010 = vmatmul.msk.f32.vlgmr.msrb.gmra.mxu2 %vm802_vm9, %v919_v6  ;;  %3089 = vmatmul.msk.f32.gmra.mxu0 %vm1275_vm11, %v3076_v51  ;;  %v3363_v51 = vunpack.i.h.bf16 %v4074_v47  ;;  %v3137_v6 = vld [vmem:[%s5257_s7 + $0x138] sm:$0xff]  ;;  %v3081_v47 = vld [vmem:[%s5257_s7 + $0xb0] sm:$0xff] }
 0x1a8   :  { %3100 = vmatmul.msk.f32.gmra.mxu1 %vm1275_vm11, %v1242_v21  ;;  %3146 = vmatpush.msk.msrb.mxu2 %vm1312_vm10, %v4165_v16  ;;  %v869_v42 = vpop.f32.mrf.mxu1  ;;  %v1247_v21 = vld [vmem:[%s5257_s7 + $0x40] sm:$0xff] }
 0x1a9   :  { %v881_v25 = vadd.f32 %v869_v42, %v788_v56  ;;  %v1248_v56 = vld [vmem:[%s5257_s7 + $0x48] sm:$0xff] }
 0x1aa   :  { %1656 = vmatpush.msrb.mxu2 %v3367_v52  ;;  %v3082_v52 = vld [vmem:[%s5257_s7 + $0xb8] sm:$0xff]  ;;  %v3139_v42 = vld [vmem:[%s5257_s7 + $0x148] sm:$0xff] }
 0x1ab   :  { %v913_v35 = vadd.f32 %v4052_v10, %v881_v25  ;;  %v420_v10 = vadd.f32 %v4147_v4, %v327_v29  ;;  %v3140_v25 = vld [vmem:[%s5257_s7 + $0x150] sm:$0xff]  ;;  %v3160_v29 = vld [vmem:[%s5257_s7 + $0x188] sm:$0xff] }
 0x1ac   :  { %1657 = vmatpush.msrb.mxu2 %v3368_v40  ;;  %v3111_v40 = vld [vmem:[%s5257_s7 + $0xd0] sm:$0xff] }
 0x1ad   :  { %v921_v16 = vmax.f32 %v913_v35, 0.0  ;;  %v513_v12 = vadd.f32 %v4229_v43, %v420_v10  ;;  %v3113_v35 = vld [vmem:[%s5257_s7 + $0xe0] sm:$0xff]  ;;  %v3185_v10 = vld [vmem:[%s5257_s7 + $0x1e8] sm:$0xff] }
 0x1af   :  { %3008 = vmatmul.msk.f32.vlgmr.msra.gmra.mxu3 %vm802_vm9, %v921_v16  ;;  %1202 = vmatmul.f32.vlgmr.msra.gmra.mxu2 %v924_v33  ;;  %v606_v43 = vadd.f32 %v4330_v26, %v513_v12  ;;  %v3063_v26 = vld [vmem:[%s5256_s5 + $0x350] sm:$0xff]  ;;  %v3184_v16 = vld [vmem:[%s5257_s7 + $0x1e0] sm:$0xff] }
 0x1b0   :  { %3069 = vmatpush.msk.msra.mxu3 %vm98_vm0, %v3068_v57  ;;  %3090 = vmatmul.msk.f32.gmra.mxu0 %vm1275_vm11, %v3077_v2  ;;  %v872_v59 = vpop.f32.mrf.mxu1  ;;  %v3161_v33 = vld [vmem:[%s5257_s7 + $0x190] sm:$0xff]  ;;  %v3114_v2 = vld [vmem:[%s5257_s7 + $0xe8] sm:$0xff] }
 0x1b1   :  { %3101 = vmatmul.msk.f32.gmra.mxu1 %vm1275_vm11, %v1243_v49  ;;  %v883_v4 = vadd.f32 %v872_v59, %v790_v32  ;;  %3246 = vmatpush.msk.msra.mxu2 %vm1312_vm10, %v4248_v11  ;;  %v3064_v11 = vld [vmem:[%s5256_s5 + $0x358] sm:$0xff]  ;;  %v699_v28 = vadd.f32 %v4369_v38, %v606_v43  ;;  %v3142_v49 = vld [vmem:[%s5257_s7 + $0x160] sm:$0xff]  ;;  %v3143_v59 = vld [vmem:[%s5257_s7 + $0x168] sm:$0xff] }
 0x1b2   :  { %1211 = vmatpush.msra.mxu3 %v3067_v17  ;;  %v3115_v17 = vld [vmem:[%s5257_s7 + $0xf0] sm:$0xff]  ;;  %v3187_v43 = vld [vmem:[%s5257_s7 + $0x1f8] sm:$0xff] }
 0x1b3   :  { %v915_v54 = vadd.f32 %v4037_v63, %v883_v4  ;;  %2152 = vmatpush.msra.mxu2 %v3382_v58  ;;  %v3078_v63 = vld [vmem:[%s5257_s7 + $0x98] sm:$0xff]  ;;  %v792_v38 = vadd.f32 %v782_v24, %v699_v28  ;;  %v3186_v12 = vld [vmem:[%s5257_s7 + $0x1f0] sm:$0xff] }
 0x1b4   :  { %1212 = vmatpush.msra.mxu3 %v3066_v60  ;;  %v3162_v58 = vld [vmem:[%s5257_s7 + $0x198] sm:$0xff]  ;;  %v3165_v28 = vld [vmem:[%s5257_s7 + $0x1b0] sm:$0xff] }
 0x1b5   :  { %v923_v46 = vmax.f32 %v915_v54, 0.0  ;;  %2153 = vmatpush.msra.mxu2 %v3383_v36  ;;  %v3163_v36 = vld [vmem:[%s5257_s7 + $0x1a0] sm:$0xff]  ;;  %v3116_v54 = vld [vmem:[%s5257_s7 + $0xf8] sm:$0xff] }
 0x1b6   :  { %1213 = vmatpush.msra.mxu3 %v3065_v20  ;;  %v3144_v20 = vld [vmem:[%s5257_s7 + $0x170] sm:$0xff] }
 0x1b7   :  { %3040 = vmatmul.msk.f32.vlgmr.msrb.gmra.mxu3 %vm802_vm9, %v923_v46  ;;  %3147 = vmatmul.msk.f32.vlgmr.msrb.gmra.mxu2 %vm1275_vm11, %v3134_v41  ;;  %v3164_v41 = vld [vmem:[%s5257_s7 + $0x1a8] sm:$0xff] }
 0x1b8   :  { %1214 = vmatpush.msra.mxu3 %v3064_v11  ;;  %3091 = vmatmul.msk.f32.gmra.mxu0 %vm1275_vm11, %v3078_v63  ;;  %v875_v8 = vpop.f32.mrf.mxu1  ;;  %v3117_v63 = vld [vmem:[%s5257_s7 + $0x100] sm:$0xff] }
 0x1b9   :  { %3102 = vmatmul.msk.f32.gmra.mxu1 %vm1275_vm11, %v1244_v50  ;;  %v885_v34 = vadd.f32 %v875_v8, %v792_v38  ;;  %v3145_v50 = vld [vmem:[%s5257_s7 + $0x178] sm:$0xff]  ;;  %v3118_v8 = vld [vmem:[%s5257_s7 + $0x108] sm:$0xff]  ;;  %v3234_v38 = vld [vmem:[%s5257_s7 + $0x2a0] sm:$0xff] }
 0x1ba   :  { %1215 = vmatpush.msra.mxu3 %v3063_v26  ;;  %v3188_v26 = vld [vmem:[%s5257_s7 + $0x200] sm:$0xff] }
 0x1bb   :  { %v917_v22 = vadd.f32 %v4059_v13, %v885_v34  ;;  %v3080_v13 = vld [vmem:[%s5257_s7 + $0xa8] sm:$0xff] }
 0x1bc   :  { %1216 = vmatpush.msra.mxu3 %v3062_v19 }
 0x1bd   :  { %v925_v27 = vmax.f32 %v917_v22, 0.0  ;;  %v3190_v22 = vld [vmem:[%s5257_s7 + $0x210] sm:$0xff] }
 0x1be   :  { %1217 = vmatpush.msra.mxu3 %v3061_v39  ;;  %v3166_v39 = vld [vmem:[%s5257_s7 + $0x1b8] sm:$0xff] }
 0x1bf   :  { %3148 = vmatmul.msk.f32.gmra.mxu2 %vm1275_vm11, %v3135_v9  ;;  %v3189_v9 = vld [vmem:[%s5257_s7 + $0x208] sm:$0xff] }
 0x1c0   :  { %1218 = vmatpush.msra.mxu3 %v3060_v0  ;;  %3092 = vmatmul.msk.f32.gmra.mxu0 %vm1275_vm11, %v3079_v7  ;;  %v3119_v7 = vld [vmem:[%s5257_s7 + $0x110] sm:$0xff] }
 0x1c1   :  { %3103 = vmatmul.msk.f32.gmra.mxu1 %vm1275_vm11, %v1245_v3  ;;  %v3235_v3 = vld [vmem:[%s5257_s7 + $0x2a8] sm:$0xff] }
 0x1c2   :  { %1219 = vmatpush.msra.mxu3 %v3059_v15  ;;  %v3167_v15 = vld [vmem:[%s5257_s7 + $0x1c0] sm:$0xff] }
 0x1c4   :  { %1220 = vmatpush.msra.mxu3 %v3058_v44 }
 0x1c6   :  { %1221 = vmatpush.msra.mxu3 %v3057_v48 }
 0x1c7   :  { %3070 = vmatmul.msk.f32.vlgmr.msra.gmra.mxu3 %vm802_vm9, %v925_v27  ;;  %3149 = vmatmul.msk.f32.gmra.mxu2 %vm1275_vm11, %v3136_v62  ;;  %v3120_v62 = vld [vmem:[%s5257_s7 + $0x118] sm:$0xff]  ;;  %v3236_v27 = vld [vmem:[%s5257_s7 + $0x2b0] sm:$0xff] }
 0x1c8   :  { %3121 = vmatpush.msk.msrb.mxu3 %vm1312_vm10, %v4099_v61  ;;  %3093 = vmatmul.msk.f32.gmra.mxu0 %vm1275_vm11, %v3080_v13  ;;  %v3378_v61 = vunpack.i.h.bf16 %v4180_v55  ;;  %v3138_v55 = vld [vmem:[%s5257_s7 + $0x140] sm:$0xff] }
 0x1c9   :  { %3104 = vmatmul.msk.f32.gmra.mxu1 %vm1275_vm11, %v1246_v1  ;;  %v3191_v1 = vld [vmem:[%s5257_s7 + $0x218] sm:$0xff] }
 0x1ca   :  { %1532 = vmatpush.msrb.mxu3 %v3362_v31  ;;  %v3168_v31 = vld [vmem:[%s5257_s7 + $0x1c8] sm:$0xff] }
 0x1cc   :  { %1533 = vmatpush.msrb.mxu3 %v3363_v51 }
 0x1ce   :  { %3221 = vmatpush.msk.msra.mxu3 %vm1312_vm10, %v4188_v5  ;;  %v3110_v5 = vld [vmem:[%s5257_s7 + $0xc8] sm:$0xff] }
 0x1cf   :  { %3122 = vmatmul.msk.f32.vlgmr.msrb.gmra.mxu3 %vm1275_vm11, %v3109_v45  ;;  %3150 = vmatmul.msk.f32.gmra.mxu2 %vm1275_vm11, %v3137_v6  ;;  %v3237_v45 = vld [vmem:[%s5257_s7 + $0x2b8] sm:$0xff] }
 0x1d0   :  { %3094 = vmatmul.msk.f32.gmra.mxu0 %vm1275_vm11, %v3081_v47  ;;  %2028 = vmatpush.msra.mxu3 %v3377_v23  ;;  %v3209_v23 = vld [vmem:[%s5257_s7 + $0x240] sm:$0xff]  ;;  %v3169_v47 = vld [vmem:[%s5257_s7 + $0x1d0] sm:$0xff] }
 0x1d1   :  { %3105 = vmatmul.msk.f32.gmra.mxu1 %vm1275_vm11, %v1247_v21  ;;  %v3192_v21 = vld [vmem:[%s5257_s7 + $0x220] sm:$0xff] }
 0x1d2   :  { %2029 = vmatpush.msra.mxu3 %v3378_v61 }
 0x1d7   :  { %3123 = vmatmul.msk.f32.gmra.mxu3 %vm1275_vm11, %v3110_v5  ;;  %3151 = vmatmul.msk.f32.gmra.mxu2 %vm1275_vm11, %v3138_v55 }
 0x1d8   :  { %3095 = vmatmul.msk.f32.gmra.mxu0 %vm1275_vm11, %v3082_v52 }
 0x1d9   :  { %3106 = vmatmul.msk.f32.gmra.mxu1 %vm1275_vm11, %v1248_v56  ;;  %v3210_v56 = vld [vmem:[%s5257_s7 + $0x248] sm:$0xff] }
 0x1df   :  { %3124 = vmatmul.msk.f32.gmra.mxu3 %vm1275_vm11, %v3111_v40  ;;  %3152 = vmatmul.msk.f32.gmra.mxu2 %vm1275_vm11, %v3139_v42  ;;  %v3238_v40 = vld [vmem:[%s5257_s7 + $0x2c0] sm:$0xff] }
 0x1e0   :  { %3172 = vmatmul.msk.f32.vlgmr.msrb.gmra.mxu0 %vm1275_vm11, %v3159_v30 }
 0x1e1   :  { %3107 = vmatmul.msk.f32.gmra.mxu1 %vm1275_vm11, %v1249_v53  ;;  %v3170_v53 = vld [vmem:[%s5257_s7 + $0x1d8] sm:$0xff] }
 0x1e7   :  { %3125 = vmatmul.msk.f32.gmra.mxu3 %vm1275_vm11, %v3112_v14  ;;  %3153 = vmatmul.msk.f32.gmra.mxu2 %vm1275_vm11, %v3140_v25  ;;  %v3193_v25 = vld [vmem:[%s5257_s7 + $0x228] sm:$0xff] }
 0x1e8   :  { %3173 = vmatmul.msk.f32.gmra.mxu0 %vm1275_vm11, %v3160_v29 }
 0x1e9   :  { %3108 = vmatmul.msk.f32.gmra.mxu1 %vm1275_vm11, %v1250_v37 }
 0x1ef   :  { %3126 = vmatmul.msk.f32.gmra.mxu3 %vm1275_vm11, %v3113_v35  ;;  %3154 = vmatmul.msk.f32.gmra.mxu2 %vm1275_vm11, %v3141_v18 }
 0x1f0   :  { %3174 = vmatmul.msk.f32.gmra.mxu0 %vm1275_vm11, %v3161_v33  ;;  %v3211_v33 = vld [vmem:[%s5257_s7 + $0x250] sm:$0xff] }
 0x1f1   :  { %3197 = vmatmul.msk.f32.vlgmr.msra.gmra.mxu1 %vm1275_vm11, %v3184_v16  ;;  %v3239_v16 = vld [vmem:[%s5257_s7 + $0x2c8] sm:$0xff] }
 0x1f4   :  { %v4602_v57 = vpop.f32.mrf.mxu0 }
 0x1f7   :  { %3127 = vmatmul.msk.f32.gmra.mxu3 %vm1275_vm11, %v3114_v2  ;;  %3155 = vmatmul.msk.f32.gmra.mxu2 %vm1275_vm11, %v3142_v49  ;;  %v3259_v49 = vld [vmem:[%s5257_s7 + $0x300] sm:$0xff] }
 0x1f8   :  { %3175 = vmatmul.msk.f32.gmra.mxu0 %vm1275_vm11, %v3162_v58 }
 0x1f9   :  { %3198 = vmatmul.msk.f32.gmra.mxu1 %vm1275_vm11, %v3185_v10  ;;  %v3194_v10 = vld [vmem:[%s5257_s7 + $0x230] sm:$0xff] }
 0x1fc   :  { %v4620_v32 = vpop.f32.mrf.mxu0 }
 0x1ff   :  { %3128 = vmatmul.msk.f32.gmra.mxu3 %vm1275_vm11, %v3115_v17  ;;  %3156 = vmatmul.msk.f32.gmra.mxu2 %vm1275_vm11, %v3143_v59  ;;  %v3212_v59 = vld [vmem:[%s5257_s7 + $0x258] sm:$0xff] }
 0x200   :  { %3176 = vmatmul.msk.f32.gmra.mxu0 %vm1275_vm11, %v3163_v36  ;;  %v3240_v36 = vld [vmem:[%s5257_s7 + $0x2d0] sm:$0xff] }
 0x201   :  { %3199 = vmatmul.msk.f32.gmra.mxu1 %vm1275_vm11, %v3186_v12 }
 0x202   :  { %v1006_v44 = vpop.f32.mrf.mxu2 }
 0x204   :  { %v4638_v4 = vpop.f32.mrf.mxu1  ;;  %v4640_v60 = vpop.f32.mrf.mxu0 }
 0x207   :  { %3129 = vmatmul.msk.f32.gmra.mxu3 %vm1275_vm11, %v3116_v54  ;;  %3157 = vmatmul.msk.f32.gmra.mxu2 %vm1275_vm11, %v3144_v20  ;;  %v3195_v20 = vld [vmem:[%s5257_s7 + $0x238] sm:$0xff] }
 0x208   :  { %3177 = vmatmul.msk.f32.gmra.mxu0 %vm1275_vm11, %v3164_v41 }
 0x209   :  { %3200 = vmatmul.msk.f32.gmra.mxu1 %vm1275_vm11, %v3187_v43 }
 0x20c   :  { %v4658_v46 = vpop.f32.mrf.mxu0  ;;  %v4660_v11 = vpop.f32.mrf.mxu1 }
 0x20f   :  { %3130 = vmatmul.msk.f32.gmra.mxu3 %vm1275_vm11, %v3117_v63  ;;  %3158 = vmatmul.msk.f32.gmra.mxu2 %vm1275_vm11, %v3145_v50 }
 0x210   :  { %3178 = vmatmul.msk.f32.gmra.mxu0 %vm1275_vm11, %v3165_v28  ;;  %v3213_v28 = vld [vmem:[%s5257_s7 + $0x260] sm:$0xff] }
 0x211   :  { %3201 = vmatmul.msk.f32.gmra.mxu1 %vm1275_vm11, %v3188_v26  ;;  %v3241_v26 = vld [vmem:[%s5257_s7 + $0x2d8] sm:$0xff] }
 0x214   :  { %v4678_v24 = vpop.f32.mrf.mxu0  ;;  %v4680_v19 = vpop.f32.mrf.mxu1 }
 0x217   :  { %3131 = vmatmul.msk.f32.gmra.mxu3 %vm1275_vm11, %v3118_v8  ;;  %3247 = vmatmul.msk.f32.vlgmr.msra.gmra.mxu2 %vm1275_vm11, %v3234_v38 }
 0x218   :  { %3179 = vmatmul.msk.f32.gmra.mxu0 %vm1275_vm11, %v3166_v39  ;;  %v3261_v39 = vld [vmem:[%s5257_s7 + $0x310] sm:$0xff] }
 0x219   :  { %3202 = vmatmul.msk.f32.gmra.mxu1 %vm1275_vm11, %v3189_v9 }
 0x21c   :  { %v4698_v34 = vpop.f32.mrf.mxu0  ;;  %v4700_v0 = vpop.f32.mrf.mxu1 }
 0x21f   :  { %3132 = vmatmul.msk.f32.gmra.mxu3 %vm1275_vm11, %v3119_v7  ;;  %3248 = vmatmul.msk.f32.gmra.mxu2 %vm1275_vm11, %v3235_v3 }
 0x220   :  { %3180 = vmatmul.msk.f32.gmra.mxu0 %vm1275_vm11, %v3167_v15 }
 0x221   :  { %3203 = vmatmul.msk.f32.gmra.mxu1 %vm1275_vm11, %v3190_v22  ;;  %v3214_v22 = vld [vmem:[%s5257_s7 + $0x268] sm:$0xff] }
 0x224   :  { %v4718_v48 = vpop.f32.mrf.mxu0 }
 0x225   :  { %v4726_v13 = vpop.f32.mrf.mxu1 }
 0x227   :  { %3133 = vmatmul.msk.f32.gmra.mxu3 %vm1275_vm11, %v3120_v62  ;;  %3249 = vmatmul.msk.f32.gmra.mxu2 %vm1275_vm11, %v3236_v27  ;;  %v3262_v27 = vld [vmem:[%s5257_s7 + $0x318] sm:$0xff] }
 0x228   :  { %3181 = vmatmul.msk.f32.gmra.mxu0 %vm1275_vm11, %v3168_v31 }
 0x229   :  { %3204 = vmatmul.msk.f32.gmra.mxu1 %vm1275_vm11, %v3191_v1 }
 0x22a   :  { %v1072_v51 = vpop.f32.mrf.mxu2 }
 0x22d   :  { %v4744_v6 = vpop.f32.mrf.mxu0 }
 0x22e   :  { %v4749_v61 = vpop.f32.mrf.mxu1 }
 0x22f   :  { %3222 = vmatmul.msk.f32.vlgmr.msra.gmra.mxu3 %vm1275_vm11, %v3209_v23  ;;  %3250 = vmatmul.msk.f32.gmra.mxu2 %vm1275_vm11, %v3237_v45  ;;  %v3215_v45 = vld [vmem:[%s5257_s7 + $0x270] sm:$0xff] }
 0x230   :  { %3182 = vmatmul.msk.f32.gmra.mxu0 %vm1275_vm11, %v3169_v47  ;;  %v3243_v47 = vld [vmem:[%s5257_s7 + $0x2e8] sm:$0xff] }
 0x231   :  { %3205 = vmatmul.msk.f32.gmra.mxu1 %vm1275_vm11, %v3192_v21 }
 0x232   :  { %v1026_v5 = vpop.f32.mrf.mxu3  ;;  %v1203_v55 = vpop.f32.mrf.mxu2 }
 0x233   :  { %v1027_v52 = vadd.f32 %v1026_v5, %v1006_v44  ;;  %v3242_v44 = vld [vmem:[%s5257_s7 + $0x2e0] sm:$0xff] }
 0x234   :  { %v3263_v5 = vld [vmem:[%s5257_s7 + $0x320] sm:$0xff] }
 0x235   :  { %v1053_v42 = vadd.f32 %v4602_v57, %v1027_v52  ;;  %v1353_v30 = vpop.f32.mrf.mxu0 }
 0x236   :  { %v4768_v14 = vpop.f32.mrf.mxu1 }
 0x237   :  { %3223 = vmatmul.msk.f32.gmra.mxu3 %vm1275_vm11, %v3210_v56  ;;  %v1073_v29 = vadd.f32 %v1072_v51, %v1053_v42  ;;  %3251 = vmatmul.msk.f32.gmra.mxu2 %vm1275_vm11, %v3238_v40 }
 0x238   :  { %3183 = vmatmul.msk.f32.gmra.mxu0 %vm1275_vm11, %v3170_v53 }
 0x239   :  { %3206 = vmatmul.msk.f32.gmra.mxu1 %vm1275_vm11, %v3193_v25  ;;  %v3216_v25 = vld [vmem:[%s5257_s7 + $0x278] sm:$0xff] }
 0x23a   :  { %v1147_v37 = vpop.f32.mrf.mxu3  ;;  %v4777_v35 = vpop.f32.mrf.mxu2 }
 0x23b   :  { %v1148_v18 = vadd.f32 %v1147_v37, %v4638_v4  ;;  %v3260_v4 = vld [vmem:[%s5257_s7 + $0x308] sm:$0xff]  ;;  %v1430_v37 = vadd.f32 %v4700_v0, %v4658_v46  ;;  %v3245_v46 = vld [vmem:[%s5257_s7 + $0x2f8] sm:$0xff] }
 0x23d   :  { %v1150_v57 = vadd.f32 %v1148_v18, %v1073_v29  ;;  %v1356_v2 = vpop.f32.mrf.mxu0  ;;  %v3264_v29 = vld [vmem:[%s5257_s7 + $0x328] sm:$0xff] }
 0x23e   :  { %v4789_v58 = vpop.f32.mrf.mxu1 }
 0x23f   :  { %3224 = vmatmul.msk.f32.gmra.mxu3 %vm1275_vm11, %v3211_v33  ;;  %3252 = vmatmul.msk.f32.gmra.mxu2 %vm1275_vm11, %v3239_v16 }
 0x240   :  { %3272 = vmatmul.msk.f32.vlgmr.msra.gmra.mxu0 %vm1275_vm11, %v3259_v49 }
 0x241   :  { %3207 = vmatmul.msk.f32.gmra.mxu1 %vm1275_vm11, %v3194_v10 }
 0x242   :  { %v1662_v17 = vpop.f32.mrf.mxu2 }
 0x245   :  { %v1359_v12 = vpop.f32.mrf.mxu0 }
 0x246   :  { %v1444_v54 = vpop.f32.mrf.mxu1 }
 0x247   :  { %v4810_v41 = vadd.f32 %v1444_v54, %v1353_v30  ;;  %3225 = vmatmul.msk.f32.gmra.mxu3 %vm1275_vm11, %v3212_v59  ;;  %3253 = vmatmul.msk.f32.gmra.mxu2 %vm1275_vm11, %v3240_v36  ;;  %v3265_v59 = vld [vmem:[%s5257_s7 + $0x330] sm:$0xff]  ;;  %v1433_v36 = vadd.f32 %v4726_v13, %v4678_v24  ;;  %v3266_v24 = vld [vmem:[%s5257_s7 + $0x338] sm:$0xff]  ;;  %v1436_v13 = vadd.f32 %v4749_v61, %v4698_v34  ;;  %v3267_v61 = vld [vmem:[%s5257_s7 + $0x340] sm:$0xff] }
 0x248   :  { %3273 = vmatmul.msk.f32.gmra.mxu0 %vm1275_vm11, %v3260_v4 }
 0x249   :  { %3208 = vmatmul.msk.f32.gmra.mxu1 %vm1275_vm11, %v3195_v20 }
 0x24a   :  { %v1223_v43 = vpop.f32.mrf.mxu3  ;;  %v1665_v63 = vpop.f32.mrf.mxu2 }
 0x24b   :  { %v1224_v50 = vadd.f32 %v1223_v43, %v1203_v55  ;;  %v1427_v55 = vadd.f32 %v4680_v19, %v4640_v60  ;;  %v3244_v60 = vld [vmem:[%s5257_s7 + $0x2f0] sm:$0xff] }
 0x24d   :  { %v4822_v8 = vadd.f32 %v1224_v50, %v1150_v57  ;;  %v1362_v38 = vpop.f32.mrf.mxu0 }
 0x24e   :  { %v1447_v9 = vpop.f32.mrf.mxu1 }
 0x24f   :  { %v4827_v7 = vadd.f32 %v1447_v9, %v1356_v2  ;;  %3226 = vmatmul.msk.f32.gmra.mxu3 %vm1275_vm11, %v3213_v28  ;;  %3254 = vmatmul.msk.f32.gmra.mxu2 %vm1275_vm11, %v3241_v26 }
 0x250   :  { %3274 = vmatmul.msk.f32.gmra.mxu0 %vm1275_vm11, %v3261_v39 }
 0x252   :  { %v4832_v3 = vpop.f32.mrf.mxu3  ;;  %v1668_v15 = vpop.f32.mrf.mxu2 }
 0x255   :  { %v1365_v62 = vpop.f32.mrf.mxu0 }
 0x256   :  { %v1450_v31 = vpop.f32.mrf.mxu1 }
 0x257   :  { %v4843_v1 = vadd.f32 %v1450_v31, %v1359_v12  ;;  %3227 = vmatmul.msk.f32.gmra.mxu3 %vm1275_vm11, %v3214_v22  ;;  %3255 = vmatmul.msk.f32.gmra.mxu2 %vm1275_vm11, %v3242_v44  ;;  %v3219_v44 = vld [vmem:[%s5257_s7 + $0x290] sm:$0xff] }
 0x258   :  { %3275 = vmatmul.msk.f32.gmra.mxu0 %vm1275_vm11, %v3262_v27 }
 0x25a   :  { %v1538_v51 = vpop.f32.mrf.mxu3  ;;  %v1671_v23 = vpop.f32.mrf.mxu2 }
 0x25b   :  { %v1572_v40 = vadd.f32 %v1538_v51, %v1427_v55 }
 0x25d   :  { %v4854_v21 = vpop.f32.mrf.mxu0  ;;  %v1696_v53 = vadd.f32 %v1662_v17, %v1572_v40  ;;  %v3217_v17 = vld [vmem:[%s5257_s7 + $0x280] sm:$0xff] }
 0x25e   :  { %v1453_v52 = vpop.f32.mrf.mxu1 }
 0x25f   :  { %v4861_v56 = vadd.f32 %v1453_v52, %v1362_v38  ;;  %3228 = vmatmul.msk.f32.gmra.mxu3 %vm1275_vm11, %v3215_v45  ;;  %3256 = vmatmul.msk.f32.gmra.mxu2 %vm1275_vm11, %v3243_v47  ;;  %v1439_v38 = vadd.f32 %v4768_v14, %v4718_v48  ;;  %v3289_v48 = vld [vmem:[%s5259_s9 + $0x58] sm:$0x3f]  ;;  %v1442_v14 = vadd.f32 %v4789_v58, %v4744_v6  ;;  %v2428_v6 = vld [vmem:[%s5259_s9 + $0x28] sm:$0x3f] }
 0x260   :  { %3276 = vmatmul.msk.f32.gmra.mxu0 %vm1275_vm11, %v3263_v5  ;;  %3333 = vmatpush.msk.msrb.mxu1 %vm98_vm0, %v3289_v48  ;;  %v3268_v5 = vld [vmem:[%s5257_s7 + $0x348] sm:$0xff] }
 0x261   :  { %3290 = vmatpush.msk.msrb.mxu0 %vm98_vm0, %v3289_v48  ;;  %3294 = vmatpush.msk.msrb.mxu3 %vm98_vm0, %v2428_v6  ;;  %v3311_v48 = vld [vmem:[%s5259_s9 + $0xa8] sm:$0xff]  ;;  %v3285_v6 = vld [vmem:[%s5259_s9 + $0x38] sm:$0xff] }
 0x262   :  { %v1541_v42 = vpop.f32.mrf.mxu3  ;;  %v1674_v30 = vpop.f32.mrf.mxu2 }
 0x263   :  { %v1573_v57 = vadd.f32 %v1541_v42, %v1430_v37 }
 0x265   :  { %v1786_v19 = vpop.f32.mrf.mxu0  ;;  %v1697_v10 = vadd.f32 %v1665_v63, %v1573_v57  ;;  %v3218_v63 = vld [vmem:[%s5257_s7 + $0x288] sm:$0xff] }
 0x266   :  { %v1456_v18 = vpop.f32.mrf.mxu1  ;;  %v4877_v33 = vadd.f32 %v1786_v19, %v1696_v53  ;;  %v3269_v53 = vld [vmem:[%s5257_s7 + $0x350] sm:$0xff] }
 0x267   :  { %v4879_v16 = vadd.f32 %v1456_v18, %v1365_v62  ;;  %3229 = vmatmul.msk.f32.gmra.mxu3 %vm1275_vm11, %v3216_v25  ;;  %3257 = vmatmul.msk.f32.gmra.mxu2 %vm1275_vm11, %v3244_v60  ;;  %v3313_v25 = vld [vmem:[%s5259_s9 + $0xb8] sm:$0x3f] }
 0x268   :  { %3277 = vmatmul.msk.f32.gmra.mxu0 %vm1275_vm11, %v3264_v29  ;;  %3314 = vmatpush.msk.msrb.mxu2 %vm98_vm0, %v3313_v25  ;;  %v3288_v29 = vld [vmem:[%s5259_s9 + $0x50] sm:$0xff]  ;;  %v3310_v25 = vld [vmem:[%s5259_s9 + $0xa0] sm:$0xff] }
 0x269   :  { %3334 = vmatpush.msrb.mxu1 %v3288_v29  ;;  %2460 = vmatpush.msrb.mxu0 %v3288_v29 }
 0x26a   :  { %v1544_v2 = vpop.f32.mrf.mxu3  ;;  %v1677_v49 = vpop.f32.mrf.mxu2 }
 0x26b   :  { %v1574_v4 = vadd.f32 %v1544_v2, %v1433_v36  ;;  %v3270_v2 = vld [vmem:[%s5257_s7 + $0x358] sm:$0xff] }
 0x26d   :  { %v1789_v0 = vpop.f32.mrf.mxu0  ;;  %v1698_v43 = vadd.f32 %v1668_v15, %v1574_v4  ;;  %v3312_v4 = vld [vmem:[%s5259_s9 + $0xb0] sm:$0xff] }
 0x26e   :  { %v4895_v12 = vadd.f32 %v1789_v0, %v1697_v10  ;;  %v2427_v10 = vld [vmem:[%s5259_s9 + $0x20] sm:$0xff]  ;;  %2591 = vmatpush.msrb.mxu2 %v3312_v4 }
 0x26f   :  { %3230 = vmatmul.msk.f32.gmra.mxu3 %vm1275_vm11, %v3217_v17  ;;  %3258 = vmatmul.msk.f32.gmra.mxu2 %vm1275_vm11, %v3245_v46 }
 0x270   :  { %3278 = vmatmul.msk.f32.gmra.mxu0 %vm1275_vm11, %v3265_v59  ;;  %2498 = vmatpush.msrb.mxu3 %v2427_v10 }
 0x271   :  { %2592 = vmatpush.msrb.mxu2 %v3311_v48 }
 0x272   :  { %v1547_v54 = vpop.f32.mrf.mxu3  ;;  %v1680_v20 = vpop.f32.mrf.mxu2 }
 0x273   :  { %v1575_v26 = vadd.f32 %v1547_v54, %v1436_v13  ;;  %v2426_v54 = vld [vmem:[%s5259_s9 + $0x18] sm:$0xff]  ;;  %2593 = vmatpush.msrb.mxu2 %v3310_v25 }
 0x274   :  { %2499 = vmatpush.msrb.mxu3 %v2426_v54  ;;  %v3303_v54 = vld [vmem:[%s5259_s9 + $0x88] sm:$0x3f] }
 0x275   :  { %v1792_v50 = vpop.f32.mrf.mxu0  ;;  %v1699_v22 = vadd.f32 %v1671_v23, %v1575_v26  ;;  %v3220_v23 = vld [vmem:[%s5257_s7 + $0x298] sm:$0xff]  ;;  %v2423_v26 = vld [vmem:[%s5259_s9] sm:$0xff] }
 0x276   :  { %v4908_v28 = vadd.f32 %v1792_v50, %v1698_v43  ;;  %v2425_v43 = vld [vmem:[%s5259_s9 + $0x10] sm:$0xff]  ;;  %v3287_v50 = vld [vmem:[%s5259_s9 + $0x48] sm:$0xff] }
 0x277   :  { %3231 = vmatmul.msk.f32.gmra.mxu3 %vm1275_vm11, %v3218_v63  ;;  %3335 = vmatpush.msrb.mxu1 %v3287_v50 }
 0x278   :  { %3279 = vmatmul.msk.f32.gmra.mxu0 %vm1275_vm11, %v3266_v24  ;;  %2500 = vmatpush.msrb.mxu3 %v2425_v43 }
 0x279   :  { %2461 = vmatpush.msrb.mxu0 %v3287_v50  ;;  %v3302_v50 = vld [vmem:[%s5259_s9 + $0x80] sm:$0xff] }
 0x27a   :  { %v1550_v39 = vpop.f32.mrf.mxu3  ;;  %v1683_v15 = vpop.f32.mrf.mxu2 }
 0x27b   :  { %v1576_v9 = vadd.f32 %v1550_v39, %v1439_v38 }
 0x27d   :  { %v1700_v62 = vadd.f32 %v1674_v30, %v1576_v9  ;;  %v1795_v34 = vpop.f32.mrf.mxu0 }
 0x27e   :  { %v4920_v27 = vadd.f32 %v1795_v34, %v1699_v22 }
 0x27f   :  { %3232 = vmatmul.msk.f32.gmra.mxu3 %vm1275_vm11, %v3219_v44 }
 0x280   :  { %3280 = vmatmul.msk.f32.gmra.mxu0 %vm1275_vm11, %v3267_v61 }
 0x282   :  { %v1553_v31 = vpop.f32.mrf.mxu3  ;;  %v1686_v55 = vpop.f32.mrf.mxu2 }
 0x283   :  { %v1577_v51 = vadd.f32 %v1553_v31, %v1442_v14 }
 0x285   :  { %v1701_v45 = vadd.f32 %v1677_v49, %v1577_v51  ;;  %v1798_v47 = vpop.f32.mrf.mxu0 }
 0x286   :  { %v4937_v52 = vadd.f32 %v1798_v47, %v1700_v62  ;;  %v1424_v62 = vadd.f32 %v4660_v11, %v4620_v32  ;;  %v3286_v32 = vld [vmem:[%s5259_s9 + $0x40] sm:$0xff] }
 0x287   :  { %3233 = vmatmul.msk.f32.gmra.mxu3 %vm1275_vm11, %v3220_v23  ;;  %3336 = vmatpush.msrb.mxu1 %v3286_v32 }
 0x288   :  { %3281 = vmatmul.msk.f32.gmra.mxu0 %vm1275_vm11, %v3268_v5  ;;  %v1571_v14 = vadd.f32 %v4832_v3, %v1424_v62 }
 0x289   :  { %2462 = vmatpush.msrb.mxu0 %v3286_v32  ;;  %3337 = vmatpush.msrb.mxu1 %v3285_v6 }
 0x28a   :  { %v1556_v58 = vpop.f32.mrf.mxu3  ;;  %v1689_v19 = vpop.f32.mrf.mxu2  ;;  %v1695_v23 = vadd.f32 %v4777_v35, %v1571_v14 }
 0x28b   :  { %v1578_v40 = vadd.f32 %v1556_v58, %v4810_v41  ;;  %v5012_v35 = vpop.permute.xlu0 %2366  ;;  %2463 = vmatpush.msrb.mxu0 %v3285_v6 }
 0x28c   :  { %v1819_v11 = vadd.f32 %v4854_v21, %v1695_v23  ;;  %v3284_v21 = vld [vmem:[%s5259_s9 + $0x30] sm:$0xff] }
 0x28d   :  { %v1702_v42 = vadd.f32 %v1680_v20, %v1578_v40  ;;  %v1801_v30 = vpop.f32.mrf.mxu0  ;;  %2464 = vmatpush.msrb.mxu0 %v3284_v21  ;;  %3338 = vmatpush.msrb.mxu1 %v3284_v21 }
 0x28e   :  { %v4952_v60 = vadd.f32 %v1801_v30, %v1701_v45  ;;  %v2342_v30 = vpop.permute.xlu2 %2341 }
 0x28f   :  { %3304 = vmatpush.msk.msra.mxu1 %vm98_vm0, %v3303_v54  ;;  %vm2851_vm0 = vcmask 1024  }
 0x290   :  { %3282 = vmatmul.msk.f32.gmra.mxu0 %vm1275_vm11, %v3269_v53 }
 0x291   :  { %2543 = vmatpush.msra.mxu1 %v3302_v50 }
 0x292   :  { %v1559_v41 = vpop.f32.mrf.mxu3  ;;  %v1692_v17 = vpop.f32.mrf.mxu2 }
 0x293   :  { %v1579_v37 = vadd.f32 %v1559_v41, %v4827_v7  ;;  %v1907_v7 = vpop.f32.mrf.mxu1  ;;  %v5021_v10 = vpop.permute.xlu0 %2371 }
 0x294   :  { %v1943_v47 = vadd.f32 %v1907_v7, %v1819_v11 }
 0x295   :  { %v1703_v18 = vadd.f32 %v1683_v15, %v1579_v37  ;;  %v1804_v57 = vpop.f32.mrf.mxu0 }
 0x296   :  { %v4963_v49 = vadd.f32 %v1804_v57, %v1702_v42 }
 0x298   :  { %3283 = vmatmul.msk.f32.gmra.mxu0 %vm1275_vm11, %v3270_v2 }
 0x29a   :  { %v1562_v46 = vpop.f32.mrf.mxu3  ;;  %v2155_v13 = vpop.f32.mrf.mxu2 }
 0x29b   :  { %v1580_v0 = vadd.f32 %v1562_v46, %v4843_v1  ;;  %v2424_v1 = vld [vmem:[%s5259_s9 + $0x8] sm:$0xff]  ;;  %v1910_v15 = vpop.f32.mrf.mxu1 }
 0x29c   :  { %2501 = vmatpush.msrb.mxu3 %v2424_v1 }
 0x29d   :  { %v1704_v59 = vadd.f32 %v1686_v55, %v1580_v0  ;;  %v1807_v36 = vpop.f32.mrf.mxu0 }
 0x29e   :  { %v4976_v20 = vadd.f32 %v1807_v36, %v1703_v18  ;;  %2502 = vmatpush.msrb.mxu3 %v2423_v26  ;;  %v2347_v36 = vpop.permute.xlu2 %2346  ;;  %v3301_v26 = vld [vmem:[%s5259_s9 + $0x78] sm:$0xff] }
 0x29f   :  { %2544 = vmatpush.msra.mxu1 %v3301_v26 }
 0x2a2   :  { %v1565_v63 = vpop.f32.mrf.mxu3  ;;  %v2158_v61 = vpop.f32.mrf.mxu2 }
 0x2a3   :  { %v1581_v24 = vadd.f32 %v1565_v63, %v4861_v56  ;;  %v1913_v51 = vpop.f32.mrf.mxu1 }
 0x2a4   :  { %v1945_v7 = vadd.f32 %v1913_v51, %v4895_v12 }
 0x2a5   :  { %v1705_v38 = vadd.f32 %v1689_v19, %v1581_v24  ;;  %v1810_v39 = vpop.f32.mrf.mxu0  ;;  %v1944_v19 = vadd.f32 %v1910_v15, %v4877_v33  ;;  %v2352_v15 = vpop.permute.xlu0 %2351 }
 0x2a6   :  { %v4991_v9 = vadd.f32 %v1810_v39, %v1704_v59  ;;  %v2357_v11 = vpop.permute.xlu2 %2356 }
 0x2aa   :  { %v1568_v22 = vpop.f32.mrf.mxu3  ;;  %v2161_v3 = vpop.f32.mrf.mxu2 }
 0x2ab   :  { %v1582_v44 = vadd.f32 %v1568_v22, %v4879_v16  ;;  %v1916_v40 = vpop.f32.mrf.mxu1 }
 0x2ad   :  { %v1706_v56 = vadd.f32 %v1692_v17, %v1582_v44  ;;  %v1813_v34 = vpop.f32.mrf.mxu0  ;;  %v3300_v44 = vld [vmem:[%s5259_s9 + $0x70] sm:$0xff] }
 0x2ae   :  { %v5000_v31 = vadd.f32 %v1813_v34, %v1705_v38  ;;  %v1946_v38 = vadd.f32 %v1916_v40, %v4908_v28  ;;  %2545 = vmatpush.msra.mxu1 %v3300_v44  ;;  %v3299_v34 = vld [vmem:[%s5259_s9 + $0x68] sm:$0xff]  ;;  %v3298_v28 = vld [vmem:[%s5259_s9 + $0x60] sm:$0xff] }
 0x2b0   :  { %2546 = vmatpush.msra.mxu1 %v3299_v34 }
 0x2b2   :  { %v2031_v45 = vpop.f32.mrf.mxu3  ;;  %v2164_v18 = vpop.f32.mrf.mxu2  ;;  %2547 = vmatpush.msra.mxu1 %v3298_v28 }
 0x2b3   :  { %v2067_v55 = vadd.f32 %v2031_v45, %v1943_v47  ;;  %v1919_v46 = vpop.f32.mrf.mxu1 }
 0x2b4   :  { %v1947_v45 = vadd.f32 %v1919_v46, %v4920_v27 }
 0x2b5   :  { %v1816_v16 = vpop.f32.mrf.mxu0  ;;  %v2191_v42 = vadd.f32 %v2155_v13, %v2067_v55  ;;  %v3309_v13 = vld [vmem:[%s5259_s9 + $0x98] sm:$0xff] }
 0x2b6   :  { %v5007_v5 = vadd.f32 %v1816_v16, %v1706_v56  ;;  %2594 = vmatpush.msrb.mxu2 %v3309_v13  ;;  %v2362_v16 = vpop.permute.xlu1 %2361 }
 0x2ba   :  { %v2034_v58 = vpop.f32.mrf.mxu3  ;;  %v2167_v63 = vpop.f32.mrf.mxu2 }
 0x2bb   :  { %v2068_v41 = vadd.f32 %v2034_v58, %v1944_v19  ;;  %v1922_v22 = vpop.f32.mrf.mxu1 }
 0x2bd   :  { %v2279_v53 = vpop.f32.mrf.mxu0  ;;  %v2192_v17 = vadd.f32 %v2158_v61, %v2068_v41 }
 0x2be   :  { %v2315_v29 = vadd.f32 %v2279_v53, %v2191_v42  ;;  %v3308_v42 = vld [vmem:[%s5259_s9 + $0x90] sm:$0xff] }
 0x2bf   :  { %2595 = vmatpush.msrb.mxu2 %v3308_v42 }
 0x2c0   :  { %v2399_v37 = vadd.f32 %v2342_v30, %v2315_v29  ;;  %v1948_v30 = vadd.f32 %v1922_v22, %v4937_v52  ;;  %v5056_v29 = vpop.permute.xlu1 %2386 }
 0x2c2   :  { %v2411_v57 = vmax.f32 %v2399_v37, 0.0  ;;  %v2037_v2 = vpop.f32.mrf.mxu3  ;;  %v2170_v23 = vpop.f32.mrf.mxu2 }
 0x2c3   :  { %v2069_v33 = vadd.f32 %v2037_v2, %v1945_v7  ;;  %v1925_v55 = vpop.f32.mrf.mxu1 }
 0x2c4   :  { %3295 = vmatmul.msk.f32.vlgmr.msrb.gmra.mxu3 %vm2436_vm12, %v2411_v57  ;;  %v1949_v52 = vadd.f32 %v1925_v55, %v4952_v60  ;;  %v2619_v60 = vld [vmem:[%s5260_s11] sm:$0xff] }
 0x2c5   :  { %v2282_v0 = vpop.f32.mrf.mxu0  ;;  %v2193_v24 = vadd.f32 %v2161_v3, %v2069_v33  ;;  %v2620_v33 = vld [vmem:[%s5260_s11 + $0x8] sm:$0xff] }
 0x2c6   :  { %v2316_v59 = vadd.f32 %v2282_v0, %v2192_v17  ;;  %v2622_v17 = vld [vmem:[%s5260_s11 + $0x18] sm:$0xff]  ;;  %v2621_v0 = vld [vmem:[%s5260_s11 + $0x10] sm:$0xff] }
 0x2c8   :  { %v2400_v4 = vadd.f32 %v2347_v36, %v2316_v59 }
 0x2ca   :  { %v2412_v43 = vmax.f32 %v2400_v4, 0.0  ;;  %v2040_v1 = vpop.f32.mrf.mxu3  ;;  %v2173_v27 = vpop.f32.mrf.mxu2 }
 0x2cb   :  { %v2070_v62 = vadd.f32 %v2040_v1, %v1946_v38 }
 0x2cc   :  { %3296 = vmatmul.msk.f32.gmra.mxu3 %vm2436_vm12, %v2412_v43  ;;  %v2392_v43 = vpop.permute.xlu1 %2391 }
 0x2cd   :  { %v2285_v12 = vpop.f32.mrf.mxu0  ;;  %v2194_v14 = vadd.f32 %v2164_v18, %v2070_v62  ;;  %v1928_v18 = vpop.f32.mrf.mxu1 }
 0x2ce   :  { %v2317_v39 = vadd.f32 %v2285_v12, %v2193_v24 }
 0x2d0   :  { %v2401_v56 = vadd.f32 %v2352_v15, %v2317_v39 }
 0x2d2   :  { %v2413_v61 = vmax.f32 %v2401_v56, 0.0  ;;  %v2043_v48 = vpop.f32.mrf.mxu3  ;;  %v2176_v36 = vpop.f32.mrf.mxu2 }
 0x2d3   :  { %v2071_v47 = vadd.f32 %v2043_v48, %v1947_v45 }
 0x2d4   :  { %3297 = vmatmul.msk.f32.gmra.mxu3 %vm2436_vm12, %v2413_v61  ;;  %v2377_v56 = vpop.permute.xlu1 %2376 }
 0x2d5   :  { %v2288_v51 = vpop.f32.mrf.mxu0  ;;  %v2195_v40 = vadd.f32 %v2167_v63, %v2071_v47  ;;  %v1931_v63 = vpop.f32.mrf.mxu1 }
 0x2d6   :  { %v2318_v32 = vadd.f32 %v2288_v51, %v2194_v14  ;;  %v1951_v44 = vadd.f32 %v1931_v63, %v4976_v20  ;;  %v3394_v20 = vld [vmem:[%s5258_s6] ss:$0 sm:$0xff]  ;;  %v3321_v63 = vld [vmem:[%s5262_s12 + $0x28] sm:$0xff] }
 0x2d8   :  { %v2402_v3 = vadd.f32 %v2357_v11, %v2318_v32  ;;  %v2382_v32 = vpop.permute.xlu0 %2381 }
 0x2da   :  { %v2414_v6 = vmax.f32 %v2402_v3, 0.0  ;;  %v2046_v58 = vpop.f32.mrf.mxu3  ;;  %v2179_v39 = vpop.f32.mrf.mxu2 }
 0x2db   :  { %v2072_v25 = vadd.f32 %v2046_v58, %v1948_v30 }
 0x2dc   :  { %3291 = vmatmul.msk.f32.vlgmr.msrb.gmra.mxu0 %vm2436_vm12, %v2414_v6 }
 0x2dd   :  { %v2291_v21 = vpop.f32.mrf.mxu0  ;;  %v2196_v57 = vadd.f32 %v2170_v23, %v2072_v25  ;;  %v1934_v34 = vpop.f32.mrf.mxu1 }
 0x2de   :  { %v2319_v53 = vadd.f32 %v2291_v21, %v2195_v40  ;;  %v1952_v23 = vadd.f32 %v1934_v34, %v4991_v9  ;;  %v1231_v40 = vadd.f32 %v3394_v20, %v4822_v8 }
 0x2e0   :  { %v2403_v19 = vadd.f32 %v2362_v16, %v2319_v53 }
 0x2e2   :  { %v2415_v41 = vmax.f32 %v2403_v19, 0.0  ;;  %v2049_v37 = vpop.f32.mrf.mxu3 }
 0x2e3   :  { %v2073_v7 = vadd.f32 %v2049_v37, %v1949_v52 }
 0x2e4   :  { %3292 = vmatmul.msk.f32.vlgmr.msrb.gmra.mxu1 %vm2436_vm12, %v2415_v41 }
 0x2e5   :  { %v2294_v2 = vpop.f32.mrf.mxu0  ;;  %2666 = vmatpush.msrb.mxu1 %v2622_v17  ;;  %v2197_v1 = vadd.f32 %v2173_v27, %v2073_v7  ;;  %v1937_v47 = vpop.f32.mrf.mxu1  ;;  %v1232_v27 = vmax.f32 %v1231_v40, 0.0 }
 0x2e6   :  { %v2320_v46 = vadd.f32 %v2294_v2, %v2196_v57  ;;  %v1953_v21 = vadd.f32 %v1937_v47, %v5000_v31  ;;  %v2397_v7 = vpop.permute.xlu2 %2396 }
 0x2e7   :  { %2667 = vmatpush.msrb.mxu1 %v2621_v0 }
 0x2e8   :  { %v2404_v59 = vadd.f32 %v5012_v35, %v2320_v46  ;;  %v1950_v35 = vadd.f32 %v1928_v18, %v4963_v49 }
 0x2e9   :  { %2668 = vmatpush.msrb.mxu1 %v2620_v33  ;;  %v2626_v33 = vld [vmem:[%s5262_s12 + $0x18] sm:$0xff] }
 0x2ea   :  { %v2416_v4 = vmax.f32 %v2404_v59, 0.0  ;;  %v2052_v54 = vpop.f32.mrf.mxu3  ;;  %2643 = vmatpush.msra.mxu3 %v2626_v33  ;;  %v2821_v33 = vld [vmem:[%s5268_s17 + $0x50] sm:$0xff] }
 0x2eb   :  { %2669 = vmatpush.msrb.mxu1 %v2619_v60  ;;  %v2074_v12 = vadd.f32 %v2052_v54, %v1950_v35  ;;  %v2624_v60 = vld [vmem:[%s5262_s12 + $0x8] sm:$0xff] }
 0x2ec   :  { %3293 = vmatmul.msk.f32.gmra.mxu1 %vm2436_vm12, %v2416_v4  ;;  %v3323_v4 = vld [vmem:[%s5262_s12 + $0x38] sm:$0xff] }
 0x2ed   :  { %v2297_v50 = vpop.f32.mrf.mxu0  ;;  %v2198_v15 = vadd.f32 %v2176_v36, %v2074_v12  ;;  %v1940_v19 = vpop.f32.mrf.mxu1  ;;  %2694 = vmatpush.msra.mxu2 %v3323_v4  ;;  %v3327_v12 = vld [vmem:[%s5262_s12 + $0x50] sm:$0xff]  ;;  %v2819_v4 = vld [vmem:[%s5268_s17 + $0x40] sm:$0xff] }
 0x2ee   :  { %v2321_v24 = vadd.f32 %v2297_v50, %v2197_v1  ;;  %v1954_v8 = vadd.f32 %v1940_v19, %v5007_v5  ;;  %v2625_v5 = vld [vmem:[%s5262_s12 + $0x10] sm:$0xff]  ;;  %v2623_v1 = vld [vmem:[%s5262_s12] sm:$0xff] }
 0x2ef   :  { %2644 = vmatpush.msra.mxu3 %v2625_v5  ;;  %v3320_v50 = vld [vmem:[%s5262_s12 + $0x20] sm:$0xff]  ;;  %v2780_v19 = vld [vmem:[%s5265_s15 + $0x50] sm:$0xff]  ;;  %v2820_v5 = vld [vmem:[%s5268_s17 + $0x48] sm:$0xff] }
 0x2f0   :  { %v2405_v13 = vadd.f32 %v5021_v10, %v2321_v24  ;;  %v2182_v10 = vpop.f32.mrf.mxu2  ;;  %v3328_v24 = vld [vmem:[%s5262_s12 + $0x58] sm:$0xff] }
 0x2f1   :  { %2645 = vmatpush.msra.mxu3 %v2624_v60 }
 0x2f2   :  { %v2417_v26 = vmax.f32 %v2405_v13, 0.0  ;;  %v2055_v38 = vpop.f32.mrf.mxu3  ;;  %v3326_v13 = vld [vmem:[%s5262_s12 + $0x48] sm:$0xff] }
 0x2f3   :  { %v2075_v61 = vadd.f32 %v2055_v38, %v1951_v44  ;;  %2646 = vmatpush.msra.mxu3 %v2623_v1  ;;  %v2734_v38 = vld [vmem:[%s5263_s13 + $0x8] sm:$0x7f]  ;;  %v2732_v44 = vld [vmem:[%s5264_s2] sm:$0x3]  ;;  %v2817_v1 = vld [vmem:[%s5268_s17 + $0x30] sm:$0xff] }
 0x2f4   :  { %3305 = vmatmul.msk.f32.vlgmr.msra.gmra.mxu1 %vm2436_vm12, %v2417_v26  ;;  %v3325_v26 = vld [vmem:[%s5262_s12 + $0x40] sm:$0xff] }
 0x2f5   :  { %v2300_v22 = vpop.f32.mrf.mxu0  ;;  %v2199_v14 = vadd.f32 %v2179_v39, %v2075_v61  ;;  %2723 = vmatpush.msrb.mxu3 %v3328_v24  ;;  %v2733_v39 = vld [vmem:[%s5263_s13] sm:$0xff]  ;;  %3330 = vmatpush.msk.msra.mxu1 %vm2739_vm14, %v2734_v38  ;;  %v2783_v61 = vld [vmem:[%s5265_s15 + $0x68] sm:$0xff] }
 0x2f6   :  { %v2322_v62 = vadd.f32 %v2300_v22, %v2198_v15  ;;  %v2815_v24 = vld [vmem:[%s5268_s17 + $0x20] sm:$0xff] }
 0x2f7   :  { %2724 = vmatpush.msrb.mxu3 %v3327_v12  ;;  %2758 = vmatpush.msra.mxu1 %v2733_v39 }
 0x2f8   :  { %v2406_v48 = vadd.f32 %v2377_v56, %v2322_v62  ;;  %v2185_v42 = vpop.f32.mrf.mxu2  ;;  %v2785_v62 = vld [vmem:[%s5265_s15 + $0x78] sm:$0xff]  ;;  %v2784_v56 = vld [vmem:[%s5265_s15 + $0x70] sm:$0xff] }
 0x2f9   :  { %2725 = vmatpush.msrb.mxu3 %v3326_v13  ;;  %v2814_v13 = vld [vmem:[%s5268_s17 + $0x18] sm:$0xff] }
 0x2fa   :  { %v2418_v28 = vmax.f32 %v2406_v48, 0.0  ;;  %v2058_v49 = vpop.f32.mrf.mxu3 }
 0x2fb   :  { %v2076_v11 = vadd.f32 %v2058_v49, %v1952_v23  ;;  %2726 = vmatpush.msrb.mxu3 %v3325_v26  ;;  %v3395_v49 = vld [vmem:[%s5261_s10] ss:$0 sm:$0xff] }
 0x2fc   :  { %3306 = vmatmul.msk.f32.gmra.mxu1 %vm2436_vm12, %v2418_v28 }
 0x2fd   :  { %v2303_v51 = vpop.f32.mrf.mxu0  ;;  %v2200_v6 = vadd.f32 %v2182_v10, %v2076_v11 }
 0x2fe   :  { %v2323_v45 = vadd.f32 %v2303_v51, %v2199_v14 }
 0x300   :  { %v2407_v16 = vadd.f32 %v2382_v32, %v2323_v45  ;;  %v2188_v17 = vpop.f32.mrf.mxu2 }
 0x302   :  { %v2419_v3 = vmax.f32 %v2407_v16, 0.0  ;;  %v2061_v55 = vpop.f32.mrf.mxu3 }
 0x303   :  { %v2077_v30 = vadd.f32 %v2061_v55, %v1953_v21 }
 0x304   :  { %3307 = vmatmul.msk.f32.gmra.mxu1 %vm2436_vm12, %v2419_v3 }
 0x305   :  { %v2306_v58 = vpop.f32.mrf.mxu0  ;;  %v2201_v41 = vadd.f32 %v2185_v42, %v2077_v30 }
 0x306   :  { %v2324_v9 = vadd.f32 %v2306_v58, %v2200_v6 }
 0x308   :  { %v2408_v53 = vadd.f32 %v5056_v29, %v2324_v9 }
 0x30a   :  { %v2420_v25 = vmax.f32 %v2408_v53, 0.0  ;;  %v2064_v37 = vpop.f32.mrf.mxu3 }
 0x30b   :  { %v2078_v31 = vadd.f32 %v2064_v37, %v1954_v8  ;;  %v2778_v37 = vld [vmem:[%s5265_s15 + $0x40] sm:$0xff]  ;;  %v2776_v8 = vld [vmem:[%s5265_s15 + $0x30] sm:$0xff] }
 0x30c   :  { %3315 = vmatmul.msk.f32.vlgmr.msrb.gmra.mxu2 %vm2436_vm12, %v2420_v25  ;;  %3319 = vmatmul.msk.f32.vlgmr.msrb.gmra.mxu1 %vm2627_vm13, %v1232_v27  ;;  %v2782_v27 = vld [vmem:[%s5265_s15 + $0x60] sm:$0xff]  ;;  %v2781_v25 = vld [vmem:[%s5265_s15 + $0x58] sm:$0xff] }
 0x30d   :  { %v2309_v18 = vpop.f32.mrf.mxu0  ;;  %v2202_v46 = vadd.f32 %v2188_v17, %v2078_v31  ;;  %v2774_v31 = vld [vmem:[%s5265_s15 + $0x20] sm:$0xff]  ;;  %v2772_v17 = vld [vmem:[%s5265_s15 + $0x10] sm:$0xff] }
 0x30e   :  { %v2325_v57 = vadd.f32 %v2309_v18, %v2201_v41  ;;  %v2779_v41 = vld [vmem:[%s5265_s15 + $0x48] sm:$0xff]  ;;  %v2777_v18 = vld [vmem:[%s5265_s15 + $0x38] sm:$0xff] }
 0x310   :  { %v2409_v2 = vadd.f32 %v2392_v43, %v2325_v57  ;;  %v3322_v43 = vld [vmem:[%s5262_s12 + $0x30] sm:$0xff]  ;;  %v2775_v57 = vld [vmem:[%s5265_s15 + $0x28] sm:$0xff] }
 0x311   :  { %2695 = vmatpush.msra.mxu2 %v3322_v43 }
 0x312   :  { %v2421_v52 = vmax.f32 %v2409_v2, 0.0  ;;  %v2773_v2 = vld [vmem:[%s5265_s15 + $0x18] sm:$0xff] }
 0x313   :  { %2696 = vmatpush.msra.mxu2 %v3321_v63  ;;  %v2816_v63 = vld [vmem:[%s5268_s17 + $0x28] sm:$0xff] }
 0x314   :  { %3316 = vmatmul.msk.f32.gmra.mxu2 %vm2436_vm12, %v2421_v52  ;;  %3331 = vmatmul.msk.f32.vlgmr.msra.gmra.mxu1 %vm2735_vm15, %v2732_v44  ;;  %v2771_v52 = vld [vmem:[%s5265_s15 + $0x8] sm:$0xff] }
 0x315   :  { %v2312_v29 = vpop.f32.mrf.mxu0  ;;  %2697 = vmatpush.msra.mxu2 %v3320_v50 }
 0x316   :  { %v2326_v0 = vadd.f32 %v2312_v29, %v2202_v46  ;;  %v2770_v46 = vld [vmem:[%s5265_s15] sm:$0xff]  ;;  %v2826_v29 = vld [vmem:[%s5268_s17 + $0x78] sm:$0xff] }
 0x317   :  { %2790 = vmatpush.msrb.mxu2 %v2785_v62 }
 0x318   :  { %v2410_v59 = vadd.f32 %v2397_v7, %v2326_v0  ;;  %v2825_v0 = vld [vmem:[%s5268_s17 + $0x70] sm:$0xff]  ;;  %v2824_v7 = vld [vmem:[%s5268_s17 + $0x68] sm:$0xff] }
 0x319   :  { %2791 = vmatpush.msrb.mxu2 %v2784_v56  ;;  %v2813_v56 = vld [vmem:[%s5268_s17 + $0x10] sm:$0xff] }
 0x31a   :  { %v2422_v36 = vmax.f32 %v2410_v59, 0.0  ;;  %v2823_v59 = vld [vmem:[%s5268_s17 + $0x60] sm:$0xff] }
 0x31b   :  { %2792 = vmatpush.msrb.mxu2 %v2783_v61  ;;  %v2811_v61 = vld [vmem:[%s5268_s17] sm:$0xff] }
 0x31c   :  { %3317 = vmatmul.msk.f32.gmra.mxu2 %vm2436_vm12, %v2422_v36  ;;  %v2822_v36 = vld [vmem:[%s5268_s17 + $0x58] sm:$0xff] }
 0x31d   :  { %2793 = vmatpush.msrb.mxu2 %v2782_v27 }
 0x31f   :  { %2794 = vmatpush.msrb.mxu2 %v2781_v25 }
 0x321   :  { %2795 = vmatpush.msrb.mxu2 %v2780_v19 }
 0x323   :  { %2796 = vmatpush.msrb.mxu2 %v2779_v41 }
 0x325   :  { %2797 = vmatpush.msrb.mxu2 %v2778_v37 }
 0x327   :  { %2798 = vmatpush.msrb.mxu2 %v2777_v18 }
 0x329   :  { %2799 = vmatpush.msrb.mxu2 %v2776_v8 }
 0x32b   :  { %2800 = vmatpush.msrb.mxu2 %v2775_v57 }
 0x32d   :  { %2801 = vmatpush.msrb.mxu2 %v2774_v31 }
 0x32f   :  { %2802 = vmatpush.msrb.mxu2 %v2773_v2 }
 0x331   :  { %2803 = vmatpush.msrb.mxu2 %v2772_v17 }
 0x333   :  { %2804 = vmatpush.msrb.mxu2 %v2771_v52 }
 0x335   :  { %2805 = vmatpush.msrb.mxu2 %v2770_v46 }
 0x347   :  { %v2504_v15 = vpop.f32.mrf.mxu3 }
 0x34f   :  { %v2507_v51 = vpop.f32.mrf.mxu3 }
 0x357   :  { %v2510_v55 = vpop.f32.mrf.mxu3 }
 0x359   :  { %v2466_v34 = vpop.f32.mrf.mxu0 }
 0x35a   :  { %v2505_v48 = vadd.f32 %v2504_v15, %v2466_v34  ;;  %v3396_v15 = vld [vmem:[%s5266_s14] ss:$0 sm:$0xff]  ;;  %v2812_v34 = vld [vmem:[%s5268_s17 + $0x8] sm:$0xff] }
 0x361   :  { %v2469_v54 = vpop.f32.mrf.mxu1 }
 0x362   :  { %v2508_v32 = vadd.f32 %v2507_v51, %v2469_v54  ;;  %v2818_v54 = vld [vmem:[%s5268_s17 + $0x38] sm:$0xff] }
 0x369   :  { %v2472_v35 = vpop.f32.mrf.mxu1 }
 0x36a   :  { %v2511_v58 = vadd.f32 %v2510_v55, %v2472_v35 }
 0x371   :  { %v2549_v22 = vpop.f32.mrf.mxu1 }
 0x372   :  { %v2558_v28 = vadd.f32 %v2549_v22, %v2505_v48  ;;  %v24_v48 = vstv %s5269_s18 }
 0x373   :  { %25 = vst [vmem:[#allocation2] sm:$0x1] %v24_v48 }
 0x379   :  { %v2552_v23 = vpop.f32.mrf.mxu1 }
 0x37a   :  { %v2559_v16 = vadd.f32 %v2552_v23, %v2508_v32  ;;  %v3398_v51 = vld [vmem:[#allocation2] ss:$0 sm:$0xff] }
 0x381   :  { %v2555_v6 = vpop.f32.mrf.mxu1 }
 0x382   :  { %v2560_v21 = vadd.f32 %v2555_v6, %v2511_v58 }
 0x389   :  { %v2671_v60 = vpop.f32.mrf.mxu1 }
 0x38f   :  { %v2597_v14 = vpop.f32.mrf.mxu2 }
 0x390   :  { %v2606_v10 = vadd.f32 %v2597_v14, %v2558_v28  ;;  %v3397_v28 = vld [vmem:[%s5267_s16] ss:$0 sm:$0xff] }
 0x391   :  { %v2760_v38 = vpop.f32.mrf.mxu1 }
 0x392   :  { %v2613_v45 = vadd.f32 %v3395_v49, %v2606_v10 }
 0x394   :  { %v2616_v11 = vmax.f32 %v2613_v45, 0.0 }
 0x396   :  { %3318 = vmatmul.msk.f32.vlgmr.msra.gmra.mxu3 %vm2627_vm13, %v2616_v11 }
 0x397   :  { %v2600_v47 = vpop.f32.mrf.mxu2  ;;  %2831 = vmatpush.msra.mxu3 %v2826_v29 }
 0x398   :  { %v2607_v20 = vadd.f32 %v2600_v47, %v2559_v16 }
 0x399   :  { %2832 = vmatpush.msra.mxu3 %v2825_v0 }
 0x39a   :  { %v2614_v3 = vadd.f32 %v3395_v49, %v2607_v20 }
 0x39b   :  { %2833 = vmatpush.msra.mxu3 %v2824_v7 }
 0x39c   :  { %v2617_v40 = vmax.f32 %v2614_v3, 0.0 }
 0x39d   :  { %2834 = vmatpush.msra.mxu3 %v2823_v59 }
 0x39e   :  { %3324 = vmatmul.msk.f32.vlgmr.msra.gmra.mxu2 %vm2627_vm13, %v2617_v40 }
 0x39f   :  { %v2603_v9 = vpop.f32.mrf.mxu2  ;;  %2835 = vmatpush.msra.mxu3 %v2822_v36 }
 0x3a0   :  { %v2608_v42 = vadd.f32 %v2603_v9, %v2560_v21 }
 0x3a1   :  { %2836 = vmatpush.msra.mxu3 %v2821_v33 }
 0x3a2   :  { %v2615_v30 = vadd.f32 %v3395_v49, %v2608_v42 }
 0x3a3   :  { %2837 = vmatpush.msra.mxu3 %v2820_v5 }
 0x3a4   :  { %v2618_v53 = vmax.f32 %v2615_v30, 0.0 }
 0x3a5   :  { %2838 = vmatpush.msra.mxu3 %v2819_v4 }
 0x3a6   :  { %3329 = vmatmul.msk.f32.vlgmr.msrb.gmra.mxu3 %vm2627_vm13, %v2618_v53 }
 0x3a7   :  { %2839 = vmatpush.msra.mxu3 %v2818_v54 }
 0x3a9   :  { %2840 = vmatpush.msra.mxu3 %v2817_v1 }
 0x3ab   :  { %2841 = vmatpush.msra.mxu3 %v2816_v63 }
 0x3ad   :  { %2842 = vmatpush.msra.mxu3 %v2815_v24 }
 0x3af   :  { %2843 = vmatpush.msra.mxu3 %v2814_v13 }
 0x3b1   :  { %2844 = vmatpush.msra.mxu3 %v2813_v56 }
 0x3b3   :  { %2845 = vmatpush.msra.mxu3 %v2812_v34 }
 0x3b5   :  { %2846 = vmatpush.msra.mxu3 %v2811_v61 }
 0x419   :  { %v2648_v43 = vpop.f32.mrf.mxu3 }
 0x41a   :  { %v2672_v35 = vadd.f32 %v2671_v60, %v2648_v43 }
 0x421   :  { %v2699_v50 = vpop.f32.mrf.mxu2 }
 0x422   :  { %v2702_v12 = vadd.f32 %v2699_v50, %v2672_v35 }
 0x429   :  { %v2728_v26 = vpop.f32.mrf.mxu3 }
 0x42a   :  { %v2731_v39 = vadd.f32 %v2728_v26, %v2702_v12 }
 0x42c   :  { %v2763_v22 = vadd.f32 %v2760_v38, %v2731_v39 }
 0x42e   :  { %v2768_v44 = vadd.f32 %v3396_v15, %v2763_v22 }
 0x430   :  { %v2769_v62 = vmax.f32 %v2768_v44, 0.0 }
 0x432   :  { %2806 = vmatmul.f32.vlgmr.msrb.gmra.mxu2 %v2769_v62 }
 0x4b5   :  { %v2807_v49 = vpop.f32.mrf.mxu2 }
 0x4b6   :  { %v2808_v14 = vadd.f32 %v3397_v28, %v2807_v49 }
 0x4b8   :  { %v2810_v10 = vmax.f32 %v2808_v14, 0.0 }
 0x4ba   :  { %2847 = vmatmul.f32.vlgmr.msra.gmra.mxu3 %v2810_v10 }
 0x53d   :  { %v2848_v23 = vpop.f32.mrf.mxu3 }
 0x53e   :  { %v2849_v45 = vadd.f32 %v3398_v51, %v2848_v23 }
 0x540   :  { %2852 = vst.msk [vmem:[%s5270_s19] sm:$0x3] %vm2851_vm0, %v2849_v45 }

</bundles_post_ra>
